<compile_context>
chip_gen: v7x
topology: tpu7x:2x2x1
jax: 0.10.0
libtpu: 0.0.40
codegen_flags: <defaults>
</compile_context>

<pallas_src>
import functools
import math

import numpy as np
import jax
import jax.numpy as jnp
from jax.experimental import pallas as pl
from jax.experimental.pallas import tpu as pltpu


# ------------------------------ kernel ------------------------------

def mha_kernel(q_ref, k_ref, v_ref,
               wq_ref, bq_ref, wk_ref, bk_ref, wv_ref, bv_ref,
               wo_ref, bo_ref,
               out_ref, attn_ref,
               concat_ref,              # VMEM scratch (TQ, D) bf16: packed per-head outputs
               *, heads, d_k):
    inv_sqrt_dk = 1.0 / math.sqrt(d_k)

    xq = q_ref[0]                        # (TQ, D) bf16 (cast in wrapper)
    xk = k_ref[0]                        # (S,  D) bf16
    xv = v_ref[0]                        # (S,  D) bf16

    # Full-width projections: K = N = D fills the MXU instead of per-head d_k matmuls.
    qp = jnp.dot(xq, wq_ref[...], preferred_element_type=jnp.float32) + bq_ref[...]
    kp = jnp.dot(xk, wk_ref[...], preferred_element_type=jnp.float32) + bk_ref[...]
    vp = jnp.dot(xv, wv_ref[...], preferred_element_type=jnp.float32) + bv_ref[...]
    qp = qp * inv_sqrt_dk                # pre-scale q once (not every (TQ,S) score matrix)

    # Single cast per stream (hoisted out of the head loop).
    qp = qp.astype(jnp.bfloat16)
    kp = kp.astype(jnp.bfloat16)
    vp = vp.astype(jnp.bfloat16)

    # Per-head attention.  `heads` is a small static constant -> static unroll with
    # static lane slices; each head's (TQ,S) score/prob tensors are consumed immediately.
    for h in range(heads):
        lo = h * d_k
        qh = qp[:, lo:lo + d_k]          # (TQ, d_k)  static lane slices (cheap)
        kh = kp[:, lo:lo + d_k]          # (S,  d_k)
        vh = vp[:, lo:lo + d_k]          # (S,  d_k)

        # scores = qh @ kh^T  (contraction over d_k; per-head width is inherent to MHA)
        s = jnp.einsum("qd,kd->qk", qh, kh,
                       preferred_element_type=jnp.float32)          # (TQ, S) f32
        s = s - jnp.max(s, axis=-1, keepdims=True)
        p = jnp.exp(s)
        p = p * pl.reciprocal(jnp.sum(p, axis=-1, keepdims=True), approx=True)

        attn_ref[0, h] = p.astype(attn_ref.dtype)                   # bf16 writeback

        oh = jnp.dot(p.astype(jnp.bfloat16), vh,
                     preferred_element_type=jnp.float32)             # (TQ, d_k)
        concat_ref[:, lo:lo + d_k] = oh.astype(jnp.bfloat16)         # pack into (TQ, D)

    # Output projection as ONE full-width matmul on the packed buffer.
    out_ref[0] = (jnp.dot(concat_ref[...], wo_ref[...],
                          preferred_element_type=jnp.float32)
                  + bo_ref[...]).astype(out_ref.dtype)


# ------------------------------ wrapper ------------------------------

def multi_head_attention(q, k, v, params, *, heads, tq=None):
    """MultiHeadAttention.forward (mask=None): returns (output, attn)."""
    bs, S, D = q.shape
    d_k = D // heads
    if tq is None:
        tq = min(S, 128)
    assert S % tq == 0, "sequence length must be divisible by the query tile"
    nq = S // tq

    bf16, f32 = jnp.bfloat16, jnp.float32
    # Weights stay lane-dense (D, D); ship in bf16 for the MXU, biases in f32.
    wq, bq = params["wq"].astype(bf16), params["bq"].astype(f32)
    wk, bk = params["wk"].astype(bf16), params["bk"].astype(f32)
    wv, bv = params["wv"].astype(bf16), params["bv"].astype(f32)
    wo, bo = params["wo"].astype(bf16), params["bo"].astype(f32)

    def full(a):
        return pl.BlockSpec(a.shape, lambda b, qi, n=a.ndim: (0,) * n)

    q_spec = pl.BlockSpec((1, tq, D), lambda b, qi: (b, qi, 0))
    kv_spec = pl.BlockSpec((1, S, D), lambda b, qi: (b, 0, 0))

    out_shape = (jax.ShapeDtypeStruct((bs, S, D), jnp.float32),
                 jax.ShapeDtypeStruct((bs, heads, S, S), jnp.bfloat16))
    out_specs = (pl.BlockSpec((1, tq, D), lambda b, qi: (b, qi, 0)),
                 pl.BlockSpec((1, heads, tq, S), lambda b, qi: (b, 0, qi, 0)))

    kernel = functools.partial(mha_kernel, heads=heads, d_k=d_k)
    return pl.pallas_call(
        kernel,
        out_shape=out_shape,
        grid=(bs, nq),
        in_specs=[q_spec, kv_spec, kv_spec,
                  full(wq), full(bq), full(wk), full(bk),
                  full(wv), full(bv), full(wo), full(bo)],
        out_specs=out_specs,
        scratch_shapes=[pltpu.VMEM((tq, D), jnp.bfloat16)],
        compiler_params=pltpu.CompilerParams(
            dimension_semantics=("parallel", "parallel"),
            vmem_limit_bytes=32 * 1024 * 1024),
    )(q.astype(bf16), k.astype(bf16), v.astype(bf16),
      wq, bq, wk, bk, wv, bv, wo, bo)


# ------------------------------ reference (pure JAX, f32) ------------------------------

def reference_mha(q, k, v, params, *, heads):
    bs, S, D = q.shape
    d_k = D // heads
    qp = q @ params["wq"] + params["bq"]
    kp = k @ params["wk"] + params["bk"]
    vp = v @ params["wv"] + params["bv"]

    def heads_first(x):
        return x.reshape(bs, S, heads, d_k).transpose(0, 2, 1, 3)

    qh, kh, vh = heads_first(qp), heads_first(kp), heads_first(vp)
    s = jnp.einsum("bhqd,bhkd->bhqk", qh, kh) / math.sqrt(d_k)
    attn = jax.nn.softmax(s, axis=-1)
    o = jnp.einsum("bhqk,bhkd->bhqd", attn, vh)
    concat = o.transpose(0, 2, 1, 3).reshape(bs, S, D)
    out = concat @ params["wo"] + params["bo"]
    return out, attn


# ------------------------------ params ------------------------------

def init_params(key, d):
    keys = jax.random.split(key, 8)

    def w(k, shape, scale=0.05):
        return (scale * jax.random.normal(k, shape)).astype(jnp.float32)

    # Linear weights stored (in_features, out_features): y = x @ W + b
    return {
        "wq": w(keys[0], (d, d)), "bq": w(keys[1], (1, d)),
        "wk": w(keys[2], (d, d)), "bk": w(keys[3], (1, d)),
        "wv": w(keys[4], (d, d)), "bv": w(keys[5], (1, d)),
        "wo": w(keys[6], (d, d)), "bo": w(keys[7], (1, d)),
    }


# ------------------------------ main ------------------------------

if __name__ == "__main__":
    # S and D chosen as multiples of 128 so every output store is lane-dense;
    # TQ = 64 gives a (batch, seq-tile) = (2, 2) parallel grid (4 pipeline steps).
    BS, SEQ, EMB, HEADS, TQ = 2, 128, 128, 4, 64

    key = jax.random.PRNGKey(0)
    kq, kk, kv, kpar = jax.random.split(key, 4)
    q = jax.random.normal(kq, (BS, SEQ, EMB), dtype=jnp.float32)
    k = jax.random.normal(kk, (BS, SEQ, EMB), dtype=jnp.float32)
    v = jax.random.normal(kv, (BS, SEQ, EMB), dtype=jnp.float32)
    params = init_params(kpar, EMB)

    out, attn = multi_head_attention(q, k, v, params, heads=HEADS, tq=TQ)
    out, attn = jax.block_until_ready((out, attn))

    ref_out, ref_attn = reference_mha(q, k, v, params, heads=HEADS)
    ref_out, ref_attn = jax.block_until_ready((ref_out, ref_attn))

    assert out.shape == (BS, SEQ, EMB)
    assert attn.shape == (BS, HEADS, SEQ, SEQ)
    np.testing.assert_allclose(np.asarray(out, np.float32), np.asarray(ref_out),
                               atol=2e-2, rtol=2e-2)
    np.testing.assert_allclose(np.asarray(attn.astype(jnp.float32)), np.asarray(ref_attn),
                               atol=2e-2, rtol=2e-2)
    print("KERNEL_OK")
</pallas_src>

<mosaic_0001>
module attributes {stable_mosaic.version = 11 : i64} {
  func.func @mha_kernel(%arg0: i32, %arg1: i32, %arg2: memref<1x64x128xbf16, #tpu.memory_space<vmem>>, %arg3: memref<1x128x128xbf16, #tpu.memory_space<vmem>>, %arg4: memref<1x128x128xbf16, #tpu.memory_space<vmem>>, %arg5: memref<128x128xbf16, #tpu.memory_space<vmem>>, %arg6: memref<1x128xf32, #tpu.memory_space<vmem>>, %arg7: memref<128x128xbf16, #tpu.memory_space<vmem>>, %arg8: memref<1x128xf32, #tpu.memory_space<vmem>>, %arg9: memref<128x128xbf16, #tpu.memory_space<vmem>>, %arg10: memref<1x128xf32, #tpu.memory_space<vmem>>, %arg11: memref<128x128xbf16, #tpu.memory_space<vmem>>, %arg12: memref<1x128xf32, #tpu.memory_space<vmem>>, %arg13: memref<1x64x128xf32, #tpu.memory_space<vmem>>, %arg14: memref<1x4x64x128xbf16, #tpu.memory_space<vmem>>, %arg15: memref<64x128xbf16, #tpu.memory_space<vmem>>) attributes {dimension_semantics = [#tpu.dimension_semantics<parallel>, #tpu.dimension_semantics<parallel>], iteration_bounds = array<i64: 2, 2>, scalar_prefetch = 0 : i64, scratch_operands = 1 : i64, tpu.core_type = #tpu.core_type<tc>, window_params = [{transform_indices = @transform_0, window_bounds = array<i64: 1, 64, 128>}, {transform_indices = @transform_1, window_bounds = array<i64: 1, 128, 128>}, {transform_indices = @transform_2, window_bounds = array<i64: 1, 128, 128>}, {pipeline_mode = #tpu.pipeline_mode<synchronous>, transform_indices = @transform_3, window_bounds = array<i64: 128, 128>}, {pipeline_mode = #tpu.pipeline_mode<synchronous>, transform_indices = @transform_4, window_bounds = array<i64: 1, 128>}, {pipeline_mode = #tpu.pipeline_mode<synchronous>, transform_indices = @transform_5, window_bounds = array<i64: 128, 128>}, {pipeline_mode = #tpu.pipeline_mode<synchronous>, transform_indices = @transform_6, window_bounds = array<i64: 1, 128>}, {pipeline_mode = #tpu.pipeline_mode<synchronous>, transform_indices = @transform_7, window_bounds = array<i64: 128, 128>}, {pipeline_mode = #tpu.pipeline_mode<synchronous>, transform_indices = @transform_8, window_bounds = array<i64: 1, 128>}, {pipeline_mode = #tpu.pipeline_mode<synchronous>, transform_indices = @transform_9, window_bounds = array<i64: 128, 128>}, {pipeline_mode = #tpu.pipeline_mode<synchronous>, transform_indices = @transform_10, window_bounds = array<i64: 1, 128>}, {transform_indices = @transform_11, window_bounds = array<i64: 1, 64, 128>}, {transform_indices = @transform_12, window_bounds = array<i64: 1, 4, 64, 128>}]} {
    %c0 = arith.constant 0 : index
    %c0_0 = arith.constant 0 : index
    %c0_1 = arith.constant 0 : index
    %0 = vector.load %arg2[%c0, %c0_0, %c0_1] : memref<1x64x128xbf16, #tpu.memory_space<vmem>>, vector<1x64x128xbf16>
    %1 = vector.shape_cast %0 : vector<1x64x128xbf16> to vector<64x128xbf16>
    %c0_2 = arith.constant 0 : index
    %c0_3 = arith.constant 0 : index
    %c0_4 = arith.constant 0 : index
    %2 = vector.load %arg3[%c0_2, %c0_3, %c0_4] : memref<1x128x128xbf16, #tpu.memory_space<vmem>>, vector<1x128x128xbf16>
    %3 = vector.shape_cast %2 : vector<1x128x128xbf16> to vector<128x128xbf16>
    %c0_5 = arith.constant 0 : index
    %c0_6 = arith.constant 0 : index
    %c0_7 = arith.constant 0 : index
    %4 = vector.load %arg4[%c0_5, %c0_6, %c0_7] : memref<1x128x128xbf16, #tpu.memory_space<vmem>>, vector<1x128x128xbf16>
    %5 = vector.shape_cast %4 : vector<1x128x128xbf16> to vector<128x128xbf16>
    %c0_8 = arith.constant 0 : index
    %c0_9 = arith.constant 0 : index
    %6 = vector.load %arg5[%c0_8, %c0_9] : memref<128x128xbf16, #tpu.memory_space<vmem>>, vector<128x128xbf16>
    %cst = arith.constant dense<0.000000e+00> : vector<64x128xf32>
    %7 = tpu.matmul %1, %6, %cst {dimension_numbers = #tpu.dot_dimension_numbers<[1], [0], [0], [1], [0, 0, 1, 1], [], []>} : vector<64x128xbf16>, vector<128x128xbf16>, vector<64x128xf32> -> vector<64x128xf32>
    %c0_10 = arith.constant 0 : index
    %c0_11 = arith.constant 0 : index
    %8 = vector.load %arg6[%c0_10, %c0_11] : memref<1x128xf32, #tpu.memory_space<vmem>>, vector<1x128xf32>
    %9 = vector.broadcast %8 : vector<1x128xf32> to vector<64x128xf32>
    %10 = arith.addf %7, %9 : vector<64x128xf32>
    %c0_12 = arith.constant 0 : index
    %c0_13 = arith.constant 0 : index
    %11 = vector.load %arg7[%c0_12, %c0_13] : memref<128x128xbf16, #tpu.memory_space<vmem>>, vector<128x128xbf16>
    %cst_14 = arith.constant dense<0.000000e+00> : vector<128x128xf32>
    %12 = tpu.matmul %3, %11, %cst_14 {dimension_numbers = #tpu.dot_dimension_numbers<[1], [0], [0], [1], [0, 0, 1, 1], [], []>} : vector<128x128xbf16>, vector<128x128xbf16>, vector<128x128xf32> -> vector<128x128xf32>
    %c0_15 = arith.constant 0 : index
    %c0_16 = arith.constant 0 : index
    %13 = vector.load %arg8[%c0_15, %c0_16] : memref<1x128xf32, #tpu.memory_space<vmem>>, vector<1x128xf32>
    %14 = vector.broadcast %13 : vector<1x128xf32> to vector<128x128xf32>
    %15 = arith.addf %12, %14 : vector<128x128xf32>
    %c0_17 = arith.constant 0 : index
    %c0_18 = arith.constant 0 : index
    %16 = vector.load %arg9[%c0_17, %c0_18] : memref<128x128xbf16, #tpu.memory_space<vmem>>, vector<128x128xbf16>
    %cst_19 = arith.constant dense<0.000000e+00> : vector<128x128xf32>
    %17 = tpu.matmul %5, %16, %cst_19 {dimension_numbers = #tpu.dot_dimension_numbers<[1], [0], [0], [1], [0, 0, 1, 1], [], []>} : vector<128x128xbf16>, vector<128x128xbf16>, vector<128x128xf32> -> vector<128x128xf32>
    %c0_20 = arith.constant 0 : index
    %c0_21 = arith.constant 0 : index
    %18 = vector.load %arg10[%c0_20, %c0_21] : memref<1x128xf32, #tpu.memory_space<vmem>>, vector<1x128xf32>
    %19 = vector.broadcast %18 : vector<1x128xf32> to vector<128x128xf32>
    %20 = arith.addf %17, %19 : vector<128x128xf32>
    %cst_22 = arith.constant 0.176776692 : f32
    %21 = vector.broadcast %cst_22 : f32 to vector<64x128xf32>
    %22 = arith.mulf %10, %21 : vector<64x128xf32>
    %23 = arith.truncf %22 : vector<64x128xf32> to vector<64x128xbf16>
    %24 = arith.truncf %15 : vector<128x128xf32> to vector<128x128xbf16>
    %25 = arith.truncf %20 : vector<128x128xf32> to vector<128x128xbf16>
    %26 = vector.extract_strided_slice %23 {offsets = [0, 0], sizes = [64, 32], strides = [1, 1]} : vector<64x128xbf16> to vector<64x32xbf16>
    %27 = vector.extract_strided_slice %24 {offsets = [0, 0], sizes = [128, 32], strides = [1, 1]} : vector<128x128xbf16> to vector<128x32xbf16>
    %28 = vector.extract_strided_slice %25 {offsets = [0, 0], sizes = [128, 32], strides = [1, 1]} : vector<128x128xbf16> to vector<128x32xbf16>
    "tpu.trace_start"() <{level = 10 : i32, message = "qd,kd->qk"}> : () -> ()
    %cst_23 = arith.constant dense<0.000000e+00> : vector<64x128xf32>
    %29 = tpu.matmul %26, %27, %cst_23 {dimension_numbers = #tpu.dot_dimension_numbers<[1], [1], [0], [0], [0, 0, 1, 0], [], []>} : vector<64x32xbf16>, vector<128x32xbf16>, vector<64x128xf32> -> vector<64x128xf32>
    "tpu.trace_stop"() : () -> ()
    %cst_24 = arith.constant dense<0xFF800000> : vector<64xf32>
    %30 = vector.multi_reduction <maximumf>, %29, %cst_24 [1] : vector<64x128xf32> to vector<64xf32>
    %31 = vector.shape_cast %30 : vector<64xf32> to vector<64x1xf32>
    %32 = vector.broadcast %31 : vector<64x1xf32> to vector<64x128xf32>
    %33 = arith.subf %29, %32 : vector<64x128xf32>
    %34 = math.exp %33 : vector<64x128xf32>
    %cst_25 = arith.constant dense<0.000000e+00> : vector<64xf32>
    %35 = vector.multi_reduction <add>, %34, %cst_25 [1] : vector<64x128xf32> to vector<64xf32>
    %36 = vector.shape_cast %35 : vector<64xf32> to vector<64x1xf32>
    %37 = tpu.reciprocal %36 {approx = true} : vector<64x1xf32> -> vector<64x1xf32>
    %38 = vector.broadcast %37 : vector<64x1xf32> to vector<64x128xf32>
    %39 = arith.mulf %34, %38 : vector<64x128xf32>
    %40 = arith.truncf %39 : vector<64x128xf32> to vector<64x128xbf16>
    %c0_26 = arith.constant 0 : index
    %c0_27 = arith.constant 0 : index
    %c0_28 = arith.constant 0 : index
    %c0_29 = arith.constant 0 : index
    %41 = vector.load %arg14[%c0_26, %c0_27, %c0_28, %c0_29] : memref<1x4x64x128xbf16, #tpu.memory_space<vmem>>, vector<1x1x64x128xbf16>
    %42 = vector.shape_cast %41 : vector<1x1x64x128xbf16> to vector<64x128xbf16>
    %43 = vector.shape_cast %40 : vector<64x128xbf16> to vector<1x1x64x128xbf16>
    tpu.vector_store %arg14[%c0_26, %c0_27, %c0_28, %c0_29], %43 {strides = array<i32>} : memref<1x4x64x128xbf16, #tpu.memory_space<vmem>>, vector<1x1x64x128xbf16>,
    %44 = arith.truncf %39 : vector<64x128xf32> to vector<64x128xbf16>
    %cst_30 = arith.constant dense<0.000000e+00> : vector<64x32xf32>
    %45 = tpu.matmul %44, %28, %cst_30 {dimension_numbers = #tpu.dot_dimension_numbers<[1], [0], [0], [1], [0, 0, 1, 1], [], []>} : vector<64x128xbf16>, vector<128x32xbf16>, vector<64x32xf32> -> vector<64x32xf32>
    %46 = arith.truncf %45 : vector<64x32xf32> to vector<64x32xbf16>
    %c0_31 = arith.constant 0 : index
    %c0_32 = arith.constant 0 : index
    %47 = vector.load %arg15[%c0_31, %c0_32] : memref<64x128xbf16, #tpu.memory_space<vmem>>, vector<64x32xbf16>
    tpu.vector_store %arg15[%c0_31, %c0_32], %46 {strides = array<i32>} : memref<64x128xbf16, #tpu.memory_space<vmem>>, vector<64x32xbf16>,
    %48 = vector.extract_strided_slice %23 {offsets = [0, 32], sizes = [64, 32], strides = [1, 1]} : vector<64x128xbf16> to vector<64x32xbf16>
    %49 = vector.extract_strided_slice %24 {offsets = [0, 32], sizes = [128, 32], strides = [1, 1]} : vector<128x128xbf16> to vector<128x32xbf16>
    %50 = vector.extract_strided_slice %25 {offsets = [0, 32], sizes = [128, 32], strides = [1, 1]} : vector<128x128xbf16> to vector<128x32xbf16>
    "tpu.trace_start"() <{level = 10 : i32, message = "qd,kd->qk"}> : () -> ()
    %cst_33 = arith.constant dense<0.000000e+00> : vector<64x128xf32>
    %51 = tpu.matmul %48, %49, %cst_33 {dimension_numbers = #tpu.dot_dimension_numbers<[1], [1], [0], [0], [0, 0, 1, 0], [], []>} : vector<64x32xbf16>, vector<128x32xbf16>, vector<64x128xf32> -> vector<64x128xf32>
    "tpu.trace_stop"() : () -> ()
    %cst_34 = arith.constant dense<0xFF800000> : vector<64xf32>
    %52 = vector.multi_reduction <maximumf>, %51, %cst_34 [1] : vector<64x128xf32> to vector<64xf32>
    %53 = vector.shape_cast %52 : vector<64xf32> to vector<64x1xf32>
    %54 = vector.broadcast %53 : vector<64x1xf32> to vector<64x128xf32>
    %55 = arith.subf %51, %54 : vector<64x128xf32>
    %56 = math.exp %55 : vector<64x128xf32>
    %cst_35 = arith.constant dense<0.000000e+00> : vector<64xf32>
    %57 = vector.multi_reduction <add>, %56, %cst_35 [1] : vector<64x128xf32> to vector<64xf32>
    %58 = vector.shape_cast %57 : vector<64xf32> to vector<64x1xf32>
    %59 = tpu.reciprocal %58 {approx = true} : vector<64x1xf32> -> vector<64x1xf32>
    %60 = vector.broadcast %59 : vector<64x1xf32> to vector<64x128xf32>
    %61 = arith.mulf %56, %60 : vector<64x128xf32>
    %62 = arith.truncf %61 : vector<64x128xf32> to vector<64x128xbf16>
    %c0_36 = arith.constant 0 : index
    %c1 = arith.constant 1 : index
    %c0_37 = arith.constant 0 : index
    %c0_38 = arith.constant 0 : index
    %63 = vector.load %arg14[%c0_36, %c1, %c0_37, %c0_38] : memref<1x4x64x128xbf16, #tpu.memory_space<vmem>>, vector<1x1x64x128xbf16>
    %64 = vector.shape_cast %63 : vector<1x1x64x128xbf16> to vector<64x128xbf16>
    %65 = vector.shape_cast %62 : vector<64x128xbf16> to vector<1x1x64x128xbf16>
    tpu.vector_store %arg14[%c0_36, %c1, %c0_37, %c0_38], %65 {strides = array<i32>} : memref<1x4x64x128xbf16, #tpu.memory_space<vmem>>, vector<1x1x64x128xbf16>,
    %66 = arith.truncf %61 : vector<64x128xf32> to vector<64x128xbf16>
    %cst_39 = arith.constant dense<0.000000e+00> : vector<64x32xf32>
    %67 = tpu.matmul %66, %50, %cst_39 {dimension_numbers = #tpu.dot_dimension_numbers<[1], [0], [0], [1], [0, 0, 1, 1], [], []>} : vector<64x128xbf16>, vector<128x32xbf16>, vector<64x32xf32> -> vector<64x32xf32>
    %68 = arith.truncf %67 : vector<64x32xf32> to vector<64x32xbf16>
    %c0_40 = arith.constant 0 : index
    %c32 = arith.constant 32 : index
    %69 = vector.load %arg15[%c0_40, %c32] : memref<64x128xbf16, #tpu.memory_space<vmem>>, vector<64x32xbf16>
    tpu.vector_store %arg15[%c0_40, %c32], %68 {strides = array<i32>} : memref<64x128xbf16, #tpu.memory_space<vmem>>, vector<64x32xbf16>,
    %70 = vector.extract_strided_slice %23 {offsets = [0, 64], sizes = [64, 32], strides = [1, 1]} : vector<64x128xbf16> to vector<64x32xbf16>
    %71 = vector.extract_strided_slice %24 {offsets = [0, 64], sizes = [128, 32], strides = [1, 1]} : vector<128x128xbf16> to vector<128x32xbf16>
    %72 = vector.extract_strided_slice %25 {offsets = [0, 64], sizes = [128, 32], strides = [1, 1]} : vector<128x128xbf16> to vector<128x32xbf16>
    "tpu.trace_start"() <{level = 10 : i32, message = "qd,kd->qk"}> : () -> ()
    %cst_41 = arith.constant dense<0.000000e+00> : vector<64x128xf32>
    %73 = tpu.matmul %70, %71, %cst_41 {dimension_numbers = #tpu.dot_dimension_numbers<[1], [1], [0], [0], [0, 0, 1, 0], [], []>} : vector<64x32xbf16>, vector<128x32xbf16>, vector<64x128xf32> -> vector<64x128xf32>
    "tpu.trace_stop"() : () -> ()
    %cst_42 = arith.constant dense<0xFF800000> : vector<64xf32>
    %74 = vector.multi_reduction <maximumf>, %73, %cst_42 [1] : vector<64x128xf32> to vector<64xf32>
    %75 = vector.shape_cast %74 : vector<64xf32> to vector<64x1xf32>
    %76 = vector.broadcast %75 : vector<64x1xf32> to vector<64x128xf32>
    %77 = arith.subf %73, %76 : vector<64x128xf32>
    %78 = math.exp %77 : vector<64x128xf32>
    %cst_43 = arith.constant dense<0.000000e+00> : vector<64xf32>
    %79 = vector.multi_reduction <add>, %78, %cst_43 [1] : vector<64x128xf32> to vector<64xf32>
    %80 = vector.shape_cast %79 : vector<64xf32> to vector<64x1xf32>
    %81 = tpu.reciprocal %80 {approx = true} : vector<64x1xf32> -> vector<64x1xf32>
    %82 = vector.broadcast %81 : vector<64x1xf32> to vector<64x128xf32>
    %83 = arith.mulf %78, %82 : vector<64x128xf32>
    %84 = arith.truncf %83 : vector<64x128xf32> to vector<64x128xbf16>
    %c0_44 = arith.constant 0 : index
    %c2 = arith.constant 2 : index
    %c0_45 = arith.constant 0 : index
    %c0_46 = arith.constant 0 : index
    %85 = vector.load %arg14[%c0_44, %c2, %c0_45, %c0_46] : memref<1x4x64x128xbf16, #tpu.memory_space<vmem>>, vector<1x1x64x128xbf16>
    %86 = vector.shape_cast %85 : vector<1x1x64x128xbf16> to vector<64x128xbf16>
    %87 = vector.shape_cast %84 : vector<64x128xbf16> to vector<1x1x64x128xbf16>
    tpu.vector_store %arg14[%c0_44, %c2, %c0_45, %c0_46], %87 {strides = array<i32>} : memref<1x4x64x128xbf16, #tpu.memory_space<vmem>>, vector<1x1x64x128xbf16>,
    %88 = arith.truncf %83 : vector<64x128xf32> to vector<64x128xbf16>
    %cst_47 = arith.constant dense<0.000000e+00> : vector<64x32xf32>
    %89 = tpu.matmul %88, %72, %cst_47 {dimension_numbers = #tpu.dot_dimension_numbers<[1], [0], [0], [1], [0, 0, 1, 1], [], []>} : vector<64x128xbf16>, vector<128x32xbf16>, vector<64x32xf32> -> vector<64x32xf32>
    %90 = arith.truncf %89 : vector<64x32xf32> to vector<64x32xbf16>
    %c0_48 = arith.constant 0 : index
    %c64 = arith.constant 64 : index
    %91 = vector.load %arg15[%c0_48, %c64] : memref<64x128xbf16, #tpu.memory_space<vmem>>, vector<64x32xbf16>
    tpu.vector_store %arg15[%c0_48, %c64], %90 {strides = array<i32>} : memref<64x128xbf16, #tpu.memory_space<vmem>>, vector<64x32xbf16>,
    %92 = vector.extract_strided_slice %23 {offsets = [0, 96], sizes = [64, 32], strides = [1, 1]} : vector<64x128xbf16> to vector<64x32xbf16>
    %93 = vector.extract_strided_slice %24 {offsets = [0, 96], sizes = [128, 32], strides = [1, 1]} : vector<128x128xbf16> to vector<128x32xbf16>
    %94 = vector.extract_strided_slice %25 {offsets = [0, 96], sizes = [128, 32], strides = [1, 1]} : vector<128x128xbf16> to vector<128x32xbf16>
    "tpu.trace_start"() <{level = 10 : i32, message = "qd,kd->qk"}> : () -> ()
    %cst_49 = arith.constant dense<0.000000e+00> : vector<64x128xf32>
    %95 = tpu.matmul %92, %93, %cst_49 {dimension_numbers = #tpu.dot_dimension_numbers<[1], [1], [0], [0], [0, 0, 1, 0], [], []>} : vector<64x32xbf16>, vector<128x32xbf16>, vector<64x128xf32> -> vector<64x128xf32>
    "tpu.trace_stop"() : () -> ()
    %cst_50 = arith.constant dense<0xFF800000> : vector<64xf32>
    %96 = vector.multi_reduction <maximumf>, %95, %cst_50 [1] : vector<64x128xf32> to vector<64xf32>
    %97 = vector.shape_cast %96 : vector<64xf32> to vector<64x1xf32>
    %98 = vector.broadcast %97 : vector<64x1xf32> to vector<64x128xf32>
    %99 = arith.subf %95, %98 : vector<64x128xf32>
    %100 = math.exp %99 : vector<64x128xf32>
    %cst_51 = arith.constant dense<0.000000e+00> : vector<64xf32>
    %101 = vector.multi_reduction <add>, %100, %cst_51 [1] : vector<64x128xf32> to vector<64xf32>
    %102 = vector.shape_cast %101 : vector<64xf32> to vector<64x1xf32>
    %103 = tpu.reciprocal %102 {approx = true} : vector<64x1xf32> -> vector<64x1xf32>
    %104 = vector.broadcast %103 : vector<64x1xf32> to vector<64x128xf32>
    %105 = arith.mulf %100, %104 : vector<64x128xf32>
    %106 = arith.truncf %105 : vector<64x128xf32> to vector<64x128xbf16>
    %c0_52 = arith.constant 0 : index
    %c3 = arith.constant 3 : index
    %c0_53 = arith.constant 0 : index
    %c0_54 = arith.constant 0 : index
    %107 = vector.load %arg14[%c0_52, %c3, %c0_53, %c0_54] : memref<1x4x64x128xbf16, #tpu.memory_space<vmem>>, vector<1x1x64x128xbf16>
    %108 = vector.shape_cast %107 : vector<1x1x64x128xbf16> to vector<64x128xbf16>
    %109 = vector.shape_cast %106 : vector<64x128xbf16> to vector<1x1x64x128xbf16>
    tpu.vector_store %arg14[%c0_52, %c3, %c0_53, %c0_54], %109 {strides = array<i32>} : memref<1x4x64x128xbf16, #tpu.memory_space<vmem>>, vector<1x1x64x128xbf16>,
    %110 = arith.truncf %105 : vector<64x128xf32> to vector<64x128xbf16>
    %cst_55 = arith.constant dense<0.000000e+00> : vector<64x32xf32>
    %111 = tpu.matmul %110, %94, %cst_55 {dimension_numbers = #tpu.dot_dimension_numbers<[1], [0], [0], [1], [0, 0, 1, 1], [], []>} : vector<64x128xbf16>, vector<128x32xbf16>, vector<64x32xf32> -> vector<64x32xf32>
    %112 = arith.truncf %111 : vector<64x32xf32> to vector<64x32xbf16>
    %c0_56 = arith.constant 0 : index
    %c96 = arith.constant 96 : index
    %113 = vector.load %arg15[%c0_56, %c96] : memref<64x128xbf16, #tpu.memory_space<vmem>>, vector<64x32xbf16>
    tpu.vector_store %arg15[%c0_56, %c96], %112 {strides = array<i32>} : memref<64x128xbf16, #tpu.memory_space<vmem>>, vector<64x32xbf16>,
    %c0_57 = arith.constant 0 : index
    %c0_58 = arith.constant 0 : index
    %114 = vector.load %arg15[%c0_57, %c0_58] : memref<64x128xbf16, #tpu.memory_space<vmem>>, vector<64x128xbf16>
    %c0_59 = arith.constant 0 : index
    %c0_60 = arith.constant 0 : index
    %115 = vector.load %arg11[%c0_59, %c0_60] : memref<128x128xbf16, #tpu.memory_space<vmem>>, vector<128x128xbf16>
    %cst_61 = arith.constant dense<0.000000e+00> : vector<64x128xf32>
    %116 = tpu.matmul %114, %115, %cst_61 {dimension_numbers = #tpu.dot_dimension_numbers<[1], [0], [0], [1], [0, 0, 1, 1], [], []>} : vector<64x128xbf16>, vector<128x128xbf16>, vector<64x128xf32> -> vector<64x128xf32>
    %c0_62 = arith.constant 0 : index
    %c0_63 = arith.constant 0 : index
    %117 = vector.load %arg12[%c0_62, %c0_63] : memref<1x128xf32, #tpu.memory_space<vmem>>, vector<1x128xf32>
    %118 = vector.broadcast %117 : vector<1x128xf32> to vector<64x128xf32>
    %119 = arith.addf %116, %118 : vector<64x128xf32>
    %c0_64 = arith.constant 0 : index
    %c0_65 = arith.constant 0 : index
    %c0_66 = arith.constant 0 : index
    %120 = vector.load %arg13[%c0_64, %c0_65, %c0_66] : memref<1x64x128xf32, #tpu.memory_space<vmem>>, vector<1x64x128xf32>
    %121 = vector.shape_cast %120 : vector<1x64x128xf32> to vector<64x128xf32>
    %122 = vector.shape_cast %119 : vector<64x128xf32> to vector<1x64x128xf32>
    tpu.vector_store %arg13[%c0_64, %c0_65, %c0_66], %122 {strides = array<i32>} : memref<1x64x128xf32, #tpu.memory_space<vmem>>, vector<1x64x128xf32>,
    return
  }
  func.func @transform_0(%arg0: i32, %arg1: i32) -> (i32, i32, i32) {
    %c0_i32 = arith.constant 0 : i32
    %c0_i32_0 = arith.constant 0 : i32
    return %arg0, %arg1, %c0_i32 : i32, i32, i32
  }
  func.func @transform_1(%arg0: i32, %arg1: i32) -> (i32, i32, i32) {
    %c0_i32 = arith.constant 0 : i32
    %c0_i32_0 = arith.constant 0 : i32
    %c0_i32_1 = arith.constant 0 : i32
    return %arg0, %c0_i32, %c0_i32_0 : i32, i32, i32
  }
  func.func @transform_2(%arg0: i32, %arg1: i32) -> (i32, i32, i32) {
    %c0_i32 = arith.constant 0 : i32
    %c0_i32_0 = arith.constant 0 : i32
    %c0_i32_1 = arith.constant 0 : i32
    return %arg0, %c0_i32, %c0_i32_0 : i32, i32, i32
  }
  func.func @transform_3(%arg0: i32, %arg1: i32) -> (i32, i32) {
    %c0_i32 = arith.constant 0 : i32
    %c0_i32_0 = arith.constant 0 : i32
    %c0_i32_1 = arith.constant 0 : i32
    return %c0_i32, %c0_i32_0 : i32, i32
  }
  func.func @transform_4(%arg0: i32, %arg1: i32) -> (i32, i32) {
    %c0_i32 = arith.constant 0 : i32
    %c0_i32_0 = arith.constant 0 : i32
    %c0_i32_1 = arith.constant 0 : i32
    return %c0_i32, %c0_i32_0 : i32, i32
  }
  func.func @transform_5(%arg0: i32, %arg1: i32) -> (i32, i32) {
    %c0_i32 = arith.constant 0 : i32
    %c0_i32_0 = arith.constant 0 : i32
    %c0_i32_1 = arith.constant 0 : i32
    return %c0_i32, %c0_i32_0 : i32, i32
  }
  func.func @transform_6(%arg0: i32, %arg1: i32) -> (i32, i32) {
    %c0_i32 = arith.constant 0 : i32
    %c0_i32_0 = arith.constant 0 : i32
    %c0_i32_1 = arith.constant 0 : i32
    return %c0_i32, %c0_i32_0 : i32, i32
  }
  func.func @transform_7(%arg0: i32, %arg1: i32) -> (i32, i32) {
    %c0_i32 = arith.constant 0 : i32
    %c0_i32_0 = arith.constant 0 : i32
    %c0_i32_1 = arith.constant 0 : i32
    return %c0_i32, %c0_i32_0 : i32, i32
  }
  func.func @transform_8(%arg0: i32, %arg1: i32) -> (i32, i32) {
    %c0_i32 = arith.constant 0 : i32
    %c0_i32_0 = arith.constant 0 : i32
    %c0_i32_1 = arith.constant 0 : i32
    return %c0_i32, %c0_i32_0 : i32, i32
  }
  func.func @transform_9(%arg0: i32, %arg1: i32) -> (i32, i32) {
    %c0_i32 = arith.constant 0 : i32
    %c0_i32_0 = arith.constant 0 : i32
    %c0_i32_1 = arith.constant 0 : i32
    return %c0_i32, %c0_i32_0 : i32, i32
  }
  func.func @transform_10(%arg0: i32, %arg1: i32) -> (i32, i32) {
    %c0_i32 = arith.constant 0 : i32
    %c0_i32_0 = arith.constant 0 : i32
    %c0_i32_1 = arith.constant 0 : i32
    return %c0_i32, %c0_i32_0 : i32, i32
  }
  func.func @transform_11(%arg0: i32, %arg1: i32) -> (i32, i32, i32) {
    %c0_i32 = arith.constant 0 : i32
    %c0_i32_0 = arith.constant 0 : i32
    return %arg0, %arg1, %c0_i32 : i32, i32, i32
  }
  func.func @transform_12(%arg0: i32, %arg1: i32) -> (i32, i32, i32, i32) {
    %c0_i32 = arith.constant 0 : i32
    %c0_i32_0 = arith.constant 0 : i32
    %c0_i32_1 = arith.constant 0 : i32
    return %arg0, %c0_i32, %arg1, %c0_i32_0 : i32, i32, i32, i32
  }
}

</mosaic_0001>

<bundles_post_ra>
// kernel: tpu_custom_call.1
= control target key start
LH: loop header
LB: loop body
LE: loop exit
PB: predicated region body
PF: predicated region fallthrough
CT: control target
= control target key end

     0   :  { %s5698_s0 = inlined_call_operand.hbm [shape: bf16[2,128,128], index: 0, kind: input, shape index: {}]   ;;  %s5699_s1 = inlined_call_operand.hbm [shape: bf16[2,128,128], index: 1, kind: input, shape index: {}]   ;;  %s5700_s2 = inlined_call_operand.hbm [shape: bf16[2,128,128], index: 2, kind: input, shape index: {}]   ;;  %s5701_s3 = inlined_call_operand.hbm [shape: bf16[128,128], index: 3, kind: input, shape index: {}]   ;;  %s5702_s4 = inlined_call_operand.vmem [shape: f32[1,128], index: 4, kind: input, shape index: {}]   ;;  %s5703_s5 = inlined_call_operand.hbm [shape: bf16[128,128], index: 5, kind: input, shape index: {}]   ;;  %s5704_s6 = inlined_call_operand.vmem [shape: f32[1,128], index: 6, kind: input, shape index: {}]   ;;  %s5705_s7 = inlined_call_operand.hbm [shape: bf16[128,128], index: 7, kind: input, shape index: {}]   ;;  %s5706_s8 = inlined_call_operand.vmem [shape: f32[1,128], index: 8, kind: input, shape index: {}]   ;;  %s5707_s9 = inlined_call_operand.hbm [shape: bf16[128,128], index: 9, kind: input, shape index: {}]   ;;  %s5708_s10 = inlined_call_operand.vmem [shape: f32[1,128], index: 10, kind: input, shape index: {}]   ;;  %s5709_s11 = inlined_call_operand.hbm [shape: f32[2,128,128], index: 11, kind: output, shape index: {0}]   ;;  %s5710_s12 = inlined_call_operand.hbm [shape: bf16[2,4,128,128], index: 12, kind: output, shape index: {1}]  }
   0x1   :  { %5742 = sst [smem:[#allocation36_spill]] %s5698_s0 }
   0x2   :  { %5743 = sst [smem:[#allocation37_spill]] %s5699_s1 }
   0x3   :  { %5744 = sst [smem:[#allocation38_spill]] %s5701_s3 }
   0x4   :  { %5745 = sst [smem:[#allocation39_spill]] %s5702_s4 }
   0x5   :  { %5746 = sst [smem:[#allocation40_spill]] %s5703_s5 }
   0x6   :  { %5747 = sst [smem:[#allocation41_spill]] %s5704_s6 }
   0x7   :  { %5748 = sst [smem:[#allocation42_spill]] %s5705_s7 }
   0x8   :  { %5749 = sst [smem:[#allocation43_spill]] %s5706_s8 }
   0x9   :  { %5750 = sst [smem:[#allocation44_spill]] %s5707_s9 }
   0xa   :  { %5751 = sst [smem:[#allocation45_spill]] %s5708_s10 }
   0xb   :  { %5752 = sst [smem:[#allocation46_spill]] %s5709_s11 }
   0xc   :  { %5753 = sst [smem:[#allocation47_spill]] %s5710_s12 }
   0xd   :  { %18 = vsyncpa [#allocation4], 0 }
   0xe   :  { %20 = vsyncpa [#allocation4 + $0x1], 0 }
   0xf   :  { %21 = vsyncpa [#allocation7], 0 }
  0x10   :  { %23 = vsyncpa [#allocation7 + $0x1], 0 }
  0x11   :  { %24 = vsyncpa [#allocation10], 0 }
  0x12   :  { %25 = vsyncpa [#allocation13], 0 }
  0x13   :  { %26 = vsyncpa [#allocation5], 0 }
  0x14   :  { %28 = vsyncpa [#allocation5 + $0x1], 0 }
  0x15   :  { %29 = vsyncpa [#allocation17], 0 }
  0x16   :  { %31 = vsyncpa [#allocation17 + $0x1], 0  ;;  %s4617_s21 = smov 0   ;;  %s4619_s22 = smov 0  }
  0x17   :  { %s4621_s23 = smov 0   ;;  %s4623_s24 = smov 0  }
  0x18   :  { %s4625_s25 = smov 0   ;;  %s4627_s26 = smov 0  }
  0x19   :  { %s4629_s27 = smov 0   ;;  %s4631_s28 = smov 0  }
  0x1a   :  { %s4633_s29 = smov 0   ;;  %s4635_s30 = smov 0  }
  0x1b   :  { %s4637_s13 = smov 0  }
  0x1c LB: > { %5754 = sst [smem:[#allocation26_spill]] %s4492_s22  ;;  %s4673_s14 = sadd.s32 4294967295, %s4528_s13   ;;  %s4528_s13 = sphi %s4637_s13, %s37_s13   ;;  %s4524_s30 = sphi %s4635_s30, %s5829_s30   ;;  %s4520_s29 = sphi %s4633_s29, %s5828_s29   ;;  %s4516_s28 = sphi %s4631_s28, %s5827_s28   ;;  %s4512_s27 = sphi %s4629_s27, %s5826_s27   ;;  %s4508_s26 = sphi %s4627_s26, %s5825_s26   ;;  %s4504_s25 = sphi %s4625_s25, %s5824_s25   ;;  %s4500_s24 = sphi %s4623_s24, %s5823_s24   ;;  %s4496_s23 = sphi %s4621_s23, %s5822_s23   ;;  %s4492_s22 = sphi %s4619_s22, %s5821_s22   ;;  %s4488_s21 = sphi %s4617_s21, %s5817_s21  }
  0x1d   : > { %5755 = sst [smem:[#allocation27_spill]] %s4496_s23  ;;  %p3049_p0 = scmp.ge.s32.totalorder %s4528_s13, 1 }
  0x1e   : > { %5756 = sst [smem:[#allocation28_spill]] %s4500_s24  ;;  %p5714_p1 = scmp.eq.s32.totalorder %s4673_s14, 0 }
  0x1f   : > { %5757 = sst [smem:[#allocation29_spill]] %s4512_s27  ;;  %p358_p2 = scmp.lt.s32.totalorder %s4528_s13, 5 }
  0x20   : > { %5758 = sst [smem:[#allocation30_spill]] %s4516_s28  ;;  %s4530_s16 = smov [#allocation9]  }
  0x21   : > { %p4678_p3 = pnand %p3049_p0, %p358_p2  ;;  %s370_s17 = sshll.u32 %s4530_s16, 4  ;;  %s371_s17 = int_to_ptr.vmem [resolvable:$true] %s370_s17 }
  0x22   : > { %s4531_s19 = smov [#allocation12]   ;;  %s5762_s3 = sld [smem:[#allocation38_spill]] }
  0x23   : > { %s5759_s15 = scalar_select %p4678_p3, 1, 0 }
  0x24   : > { %p3862_p4 = pneg %p4678_p3  ;;  %s402_s20 = sshll.u32 %s4531_s19, 4  ;;  %s4690_s20 = int_to_ptr.vmem [resolvable:$true] %s402_s20 }
  0x25   : > { %5760 = sst [smem:[#allocation31_spill]] %s5759_s15 }
  0x26   : > { %p4686_p5 = pnand %p3862_p4, %p5714_p1 }
  0x28   : > { %s5761_s18 = scalar_select %p4686_p5, 1, 0 }
  0x29   : > { %s4188_s10 = scalar_lea.hbm %s5762_s3, 1024  ;;  %p4700_p7 = pneg %p4686_p5 }
  0x2a   : > { %p4189_p6 = scmp.ne.s32.totalorder %s5762_s3, %s4188_s10  ;;  %p4195_p10 = scmp.lt.u32.totalorder %s4188_s10, %s5762_s3 }
  0x2c   : > { %p4191_p8 = pnand %p4700_p7, %p4189_p6 }
  0x2e   : > { %p4192_p9 = pneg %p4191_p8 }
  0x30   : > { %p4197_p11 = pnand %p4195_p10, %p4192_p9 }
  0x32   : > { %4200 = shalt.err (!%p4197_p11)
}
  0x33   : > { %s4201_s11 = scalar_lea.vmem %s371_s17, 1024  ;;  %p4209_p2 = scmp.lt.s32.totalorder %s371_s17, %s371_s17 }
  0x34   : > { %p4202_p12 = scmp.ne.s32.totalorder %s371_s17, %s4201_s11  ;;  %p4210_p4 = scmp.lt.s32.totalorder %s4201_s11, %s4201_s11 }
  0x36   : > { %p4204_p13 = pnand %p4202_p12, %p4700_p7  ;;  %p4211_p1 = por %p4210_p4, %p4209_p2 }
  0x38   : > { %p4205_p0 = pneg %p4204_p13 }
  0x3a   : > { %p4212_p3 = pnand %p4211_p1, %p4205_p0 }
  0x3c   : > { %4215 = shalt.err (!%p4212_p3)
}
  0x3d   : > { %s5719_s12 = smov 64   ;;  %s5721_s27 = smov 4  }
  0x3e   : > { %3865 = dma.hbm_to_vmem [thread:$0]  (!%p4686_p5), %s5762_s3, 1024, %s371_s17, [#allocation10], %s5719_s12, %s5719_s12, %s5721_s27  }
  0x3f   : > { %s5764_s7 = sld [smem:[#allocation42_spill]] }
  0x45   : > { %s4216_s4 = scalar_lea.hbm %s5764_s7, 1024 }
  0x46   : > { %p4217_p1 = scmp.ne.s32.totalorder %s5764_s7, %s4216_s4  ;;  %p4223_p8 = scmp.lt.u32.totalorder %s4216_s4, %s5764_s7 }
  0x48   : > { %p4219_p3 = pnand %p4217_p1, %p4700_p7 }
  0x4a   : > { %p4220_p6 = pneg %p4219_p3 }
  0x4c   : > { %p4225_p9 = pnand %p4223_p8, %p4220_p6 }
  0x4e   : > { %4228 = shalt.err (!%p4225_p9)
}
  0x4f   : > { %s4229_s17 = scalar_lea.vmem %s4690_s20, 1024  ;;  %p4237_p13 = scmp.lt.s32.totalorder %s4690_s20, %s4690_s20 }
  0x50   : > { %p4230_p10 = scmp.ne.s32.totalorder %s4690_s20, %s4229_s17  ;;  %p4238_p0 = scmp.lt.s32.totalorder %s4229_s17, %s4229_s17 }
  0x52   : > { %p4232_p11 = pnand %p4230_p10, %p4700_p7  ;;  %p4239_p2 = por %p4238_p0, %p4237_p13 }
  0x54   : > { %p4233_p12 = pneg %p4232_p11 }
  0x56   : > { %p4240_p4 = pnand %p4239_p2, %p4233_p12 }
  0x58   : > { %4243 = shalt.err (!%p4240_p4)
}
  0x59   : > { %3871 = dma.hbm_to_vmem [thread:$0]  (!%p4686_p5), %s5764_s7, 1024, %s4690_s20, [#allocation13], %s5719_s12, %s5719_s12, %s5721_s27  }
  0x5a   : > { %p5724_p3 = scmp.eq.s32.totalorder %s4528_s13, 0  ;;  %p91_p6 = scmp.ne.s32.totalorder %s4496_s23, %s4492_s22 }
  0x5b   : > { %p97_p8 = scmp.ne.s32.totalorder %s4492_s22, %s4488_s21  ;;  %p5723_p9 = scmp.lt.s32.totalorder %s4528_s13, 4 }
  0x5c   : > { %s458_s15 = sand.u32 1, %s4528_s13   ;;  %p93_p10 = por %p91_p6, %p5724_p3 }
  0x5d   : > { %p5765_p11 = scmp.eq.s32.totalorder %s4673_s14, 0  ;;  %s460_s10 = sand.u32 1, %s4496_s23  }
  0x5e   : > { %s4763_s28 = sshll.u32 %s460_s10, 6  ;;  %s5718_s20 = sshll.u32 %s4524_s30, 10 }
  0x5f   : > { %p4758_p12 = por %p97_p8, %p5765_p11  ;;  %s5768_s1 = sld [smem:[#allocation37_spill]] }
  0x60   : > { %s462_s21 = scalar_lea.vmem [#allocation6], %s4763_s28  ;;  %p4776_p13 = pnand %p5723_p9, %p93_p10 }
  0x61   : > { %s5766_s8 = scalar_select %p4758_p12, 1, 0 }
  0x62   : > { %s469_s0 = sshll.u32 %s462_s21, 4  ;;  %s4783_s6 = scalar_lea.sflag [#allocation7], %s458_s15  ;;  %s4781_s0 = int_to_ptr.vmem [resolvable:$true] %s469_s0 }
  0x63   : > { %5767 = sst [smem:[#allocation32_spill]] %s5766_s8  ;;  %p5735_p2 = pneg %p4776_p13 }
  0x64   : > { %s5769_s4 = scalar_select %p4776_p13, 1, 0 }
  0x65   : > { %s4771_s17 = scalar_lea.hbm %s5768_s1, %s5718_s20  ;;  %s4249_s20 = scalar_lea.hbm %s5768_s1, 2048 }
  0x66   : > { %5770 = sst [smem:[#allocation33_spill]] %s5769_s4  ;;  %s4244_s19 = scalar_lea.hbm %s4771_s17, 1024 }
  0x67   : > { %p4245_p0 = scmp.ne.s32.totalorder %s4771_s17, %s4244_s19  ;;  %p4250_p8 = scmp.lt.u32.totalorder %s4771_s17, %s5768_s1 }
  0x68   : > { %p4251_p10 = scmp.lt.u32.totalorder %s4249_s20, %s4244_s19  ;;  %p4253_p9 = scmp.lt.u32.totalorder %s4244_s19, %s4771_s17 }
  0x69   : > { %p4247_p4 = pnand %p5735_p2, %p4245_p0 }
  0x6a   : > { %p4252_p11 = por %p4251_p10, %p4250_p8 }
  0x6b   : > { %p4248_p6 = pneg %p4247_p4 }
  0x6c   : > { %p4254_p1 = por %p4253_p9, %p4252_p11 }
  0x6e   : > { %p4255_p3 = pnand %p4254_p1, %p4248_p6 }
  0x70   : > { %4258 = shalt.err (!%p4255_p3)
}
  0x71   : > { %s4259_s15 = scalar_lea.vmem %s4781_s0, 1024  ;;  %s4534_s11 = smov [#allocation6]  }
  0x72   : > { %p4260_p0 = scmp.ne.s32.totalorder %s4781_s0, %s4259_s15  ;;  %s4264_s21 = sshll.u32 %s4534_s11, 4  ;;  %s4265_s21 = int_to_ptr.vmem [resolvable:$false] %s4264_s21 }
  0x73   : > { %s4266_s12 = scalar_lea.vmem %s4265_s21, 2048  ;;  %p4267_p5 = scmp.lt.s32.totalorder %s4781_s0, %s4265_s21 }
  0x74   : > { %p4262_p4 = pnand %p4260_p0, %p5735_p2  ;;  %p4268_p8 = scmp.lt.s32.totalorder %s4266_s12, %s4259_s15 }
  0x76   : > { %p4263_p12 = pneg %p4262_p4  ;;  %p4269_p10 = por %p4268_p8, %p4267_p5 }
  0x78   : > { %p4270_p9 = pnand %p4269_p10, %p4263_p12 }
  0x7a   : > { %4273 = shalt.err (!%p4270_p9)
}
  0x7b   : > { %s5771_s27 = smov 4   ;;  %s5772_s20 = smov 64  }
  0x7c   : > { %3881 = dma.hbm_to_vmem [thread:$0]  (!%p4776_p13), %s4771_s17, 1024, %s4781_s0, %s4783_s6, %s5772_s20, %s5772_s20, %s5771_s27  }
  0x7d   : > { %s5773_s19 = sshll.u32 %s4524_s30, 10  ;;  %s483_s21 = scalar_lea.vmem [#allocation8], %s4763_s28 }
  0x7e   : > { %s4819_s15 = scalar_lea.hbm %s5700_s2, %s5773_s19  ;;  %s4822_s12 = sshll.u32 %s483_s21, 4  ;;  %s4928_s12 = int_to_ptr.vmem [resolvable:$true] %s4822_s12 }
  0x7f   : > { %s4535_s1 = smov [#allocation11]   ;;  %s5774_s5 = sld [smem:[#allocation40_spill]] }
  0x80   : > { %s386_s3 = sshll.u32 %s4535_s1, 4  ;;  %s387_s3 = int_to_ptr.vmem [resolvable:$true] %s386_s3 }
  0x85   : > { %s4274_s22 = scalar_lea.hbm %s5774_s5, 1024 }
  0x86   : > { %p4275_p5 = scmp.ne.s32.totalorder %s5774_s5, %s4274_s22  ;;  %p4281_p12 = scmp.lt.u32.totalorder %s4274_s22, %s5774_s5 }
  0x88   : > { %p4277_p1 = pnand %p4275_p5, %p4700_p7 }
  0x8a   : > { %p4278_p3 = pneg %p4277_p1 }
  0x8c   : > { %p4283_p6 = pnand %p4281_p12, %p4278_p3 }
  0x8e   : > { %4286 = shalt.err (!%p4283_p6)
}
  0x8f   : > { %s4287_s28 = scalar_lea.vmem %s387_s3, 1024  ;;  %p4295_p8 = scmp.lt.s32.totalorder %s387_s3, %s387_s3 }
  0x90   : > { %p4288_p11 = scmp.ne.s32.totalorder %s387_s3, %s4287_s28  ;;  %p4296_p10 = scmp.lt.s32.totalorder %s4287_s28, %s4287_s28 }
  0x92   : > { %p4290_p0 = pnand %p4288_p11, %p4700_p7  ;;  %p4297_p9 = por %p4296_p10, %p4295_p8 }
  0x94   : > { %p4291_p4 = pneg %p4290_p0 }
  0x96   : > { %p4298_p2 = pnand %p4297_p9, %p4291_p4 }
  0x98   : > { %4301 = shalt.err (!%p4298_p2)
}
  0x99   : > { %p5775_p5 = scmp.ne.s32.totalorder %s5761_s18, 0  ;;  %s4536_s22 = smov [#allocation14]  }
  0x9a   : > { %s418_s23 = sshll.u32 %s4536_s22, 4  ;;  %s5776_s9 = sld [smem:[#allocation44_spill]]  ;;  %s419_s23 = int_to_ptr.vmem [resolvable:$true] %s418_s23 }
  0x9b   : > { %3868 = dma.hbm_to_vmem [thread:$0]  (!%p5775_p5), %s5774_s5, 1024, %s387_s3, [#allocation10], %s5772_s20, %s5772_s20, %s5771_s27  }
  0xa0   : > { %s4302_s10 = scalar_lea.hbm %s5776_s9, 1024 }
  0xa1   : > { %p4303_p2 = scmp.ne.s32.totalorder %s5776_s9, %s4302_s10  ;;  %p4309_p12 = scmp.lt.u32.totalorder %s4302_s10, %s5776_s9 }
  0xa3   : > { %p4305_p1 = pnand %p4303_p2, %p4700_p7 }
  0xa5   : > { %p4306_p3 = pneg %p4305_p1 }
  0xa7   : > { %p4311_p6 = pnand %p4309_p12, %p4306_p3 }
  0xa9   : > { %4314 = shalt.err (!%p4311_p6)
}
  0xaa   : > { %s4315_s3 = scalar_lea.vmem %s419_s23, 1024  ;;  %p4323_p8 = scmp.lt.s32.totalorder %s419_s23, %s419_s23 }
  0xab   : > { %p4316_p11 = scmp.ne.s32.totalorder %s419_s23, %s4315_s3  ;;  %p4324_p10 = scmp.lt.s32.totalorder %s4315_s3, %s4315_s3 }
  0xad   : > { %p4318_p0 = pnand %p4316_p11, %p4700_p7  ;;  %p4325_p9 = por %p4324_p10, %p4323_p8 }
  0xaf   : > { %p4319_p4 = pneg %p4318_p0 }
  0xb1   : > { %p4326_p13 = pnand %p4325_p9, %p4319_p4 }
  0xb3   : > { %4329 = shalt.err (!%p4326_p13)
}
  0xb4   : > { %3874 = dma.hbm_to_vmem [thread:$0]  (!%p5775_p5), %s5776_s9, 1024, %s419_s23, [#allocation13], %s5772_s20, %s5772_s20, %s5771_s27  }
  0xb5   : > { %s3048_s18 = sadd.s32 4294967294, %s4528_s13   ;;  %s46_s16 = sadd.s32 1, %s4520_s29 }
  0xb6   : > { %p47_p7 = scmp.ge.s32.totalorder %s46_s16, 2  ;;  %s58_s1 = sadd.s32 1, %s4508_s26 }
  0xb7   : > { %p65_p13 = scmp.ne.s32.totalorder %s4508_s26, %s4504_s25  ;;  %p71_p2 = scmp.ne.s32.totalorder %s4504_s25, %s4500_s24 }
  0xb8   : > { %s5831_s16 = smov (%p47_p7, %s46_s16), 0  ;;  %s5778_s7 = sadd.s32 1, %s4524_s30 }
  0xb9   : > { %5777 = sst [smem:[#allocation34_spill]] %s5831_s16  ;;  %s5779_s22 = sld [smem:[#allocation27_spill]] }
  0xba   : > { %s5833_s7 = smov (!%p47_p7, %s5778_s7), %s4524_s30  ;;  %s54_s8 = ssub.s32 %s4520_s29, %s5831_s16 }
  0xbb   : > { %p5780_p1 = scmp.eq.s32.totalorder %s4528_s13, 0  ;;  %p51_p3 = scmp.ge.s32.totalorder %s5833_s7, 2 }
  0xbc   : > { %p5782_p12 = scmp.eq.s32.totalorder %s4673_s14, 0  ;;  %p5784_p11 = scmp.eq.s32.totalorder %s4673_s14, 3 }
  0xbd   : > { %p4882_p5 = por %p5780_p1, %p65_p13  ;;  %p323_p4 = scmp.eq.s32.totalorder %s3048_s18, 3 }
  0xbe   : > { %p4888_p6 = por %p5782_p12, %p71_p2  ;;  %p4894_p0 = por %p5784_p11, %p65_p13 }
  0xbf   : > { %s5835_s7 = smov (%p51_p3, %s5833_s7), 0  ;;  %p4900_p8 = por %p323_p4, %p71_p2 }
  0xc0   : > { %s5785_s10 = scalar_select %p4894_p0, 1, 0 }
  0xc1   : > { %s5786_s19 = scalar_select %p4900_p8, 1, 0 }
  0xc2   : > { %s435_s11 = sand.u32 1, %s4508_s26   ;;  %s53_s21 = ssub.s32 %s4524_s30, %s5835_s7 }
  0xc3   : > { %5787 = sst [smem:[#allocation35_spill]] %s5786_s19  ;;  %s55_s17 = sor.u32 %s54_s8, %s53_s21 }
  0xc4   : > { %p82_p10 = scmp.eq.s32.totalorder %s53_s21, 0  ;;  %p56_p9 = scmp.eq.s32.totalorder %s55_s17, 0 }
  0xc5   : > { %s3055_s3 = sshll.u32 %s435_s11, 5  ;;  %s5788_s0 = sadd.s32 1, %s5779_s22 }
  0xc6   : > { %s5837_s22 = smov (!%p82_p10, %s5779_s22), %s5788_s0  ;;  %s3056_s18 = sshll.u32 %s4520_s29, 3 }
  0xc7   : > { %s4913_s28 = scalar_select %p56_p9, %s4508_s26, %s58_s1  }
  0xc8   : > { %s3057_s5 = sshll.u32 %s4524_s30, 4  ;;  %s439_s9 = scalar_lea.vmem [#allocation3], %s3055_s3 }
  0xc9   : > { %s448_s16 = sshll.u32 %s439_s9, 4  ;;  %s445_s24 = sadd.s32 %s3057_s5, %s3056_s18  ;;  %s4917_s16 = int_to_ptr.vmem [resolvable:$true] %s448_s16 }
  0xca   : > { %s3058_s19 = sshll.u32 %s445_s24, 6  ;;  %p5789_p7 = scmp.lt.s32.totalorder %s4528_s13, 4 }
  0xcb   : > { %s5791_s17 = sld [smem:[#allocation36_spill]]  ;;  %s4935_s5 = scalar_lea.sflag [#allocation4], %s435_s11 }
  0xcc   : > { %p4923_p13 = pnand %p5789_p7, %p4882_p5 }
  0xce   : > { %p4332_p1 = pneg %p4923_p13 }
  0xd1   : > { %s4933_s0 = scalar_lea.hbm %s5791_s17, %s3058_s19  ;;  %s4335_s3 = scalar_lea.hbm %s5791_s17, 2048 }
  0xd2   : > { %s4330_s9 = scalar_lea.hbm %s4933_s0, 512  ;;  %p4336_p12 = scmp.lt.u32.totalorder %s4933_s0, %s5791_s17 }
  0xd3   : > { %p4331_p2 = scmp.ne.s32.totalorder %s4933_s0, %s4330_s9  ;;  %p4337_p11 = scmp.lt.u32.totalorder %s4335_s3, %s4330_s9 }
  0xd4   : > { %p4339_p10 = scmp.lt.u32.totalorder %s4330_s9, %s4933_s0 }
  0xd5   : > { %p4333_p5 = pnand %p4332_p1, %p4331_p2  ;;  %p4338_p4 = por %p4337_p11, %p4336_p12 }
  0xd7   : > { %p4334_p3 = pneg %p4333_p5  ;;  %p4340_p9 = por %p4339_p10, %p4338_p4 }
  0xd9   : > { %p4341_p7 = pnand %p4340_p9, %p4334_p3 }
  0xdb   : > { %4344 = shalt.err (!%p4341_p7)
}
  0xdc   : > { %s4345_s11 = scalar_lea.vmem %s4917_s16, 512  ;;  %s4537_s1 = smov [#allocation3]  }
  0xdd   : > { %p4346_p2 = scmp.ne.s32.totalorder %s4917_s16, %s4345_s11  ;;  %s4350_s21 = sshll.u32 %s4537_s1, 4  ;;  %s4351_s21 = int_to_ptr.vmem [resolvable:$false] %s4350_s21 }
  0xde   : > { %s4352_s24 = scalar_lea.vmem %s4351_s21, 1024  ;;  %p4353_p0 = scmp.lt.s32.totalorder %s4917_s16, %s4351_s21 }
  0xdf   : > { %p4348_p5 = pnand %p4346_p2, %p4332_p1  ;;  %p4354_p12 = scmp.lt.s32.totalorder %s4352_s24, %s4345_s11 }
  0xe1   : > { %p4349_p8 = pneg %p4348_p5  ;;  %p4355_p11 = por %p4354_p12, %p4353_p0 }
  0xe3   : > { %p4356_p4 = pnand %p4355_p11, %p4349_p8 }
  0xe5   : > { %4359 = shalt.err (!%p4356_p4)
}
  0xe6   : > { %s5792_s9 = sld [smem:[#allocation33_spill]]  ;;  %s4360_s23 = scalar_lea.hbm %s4819_s15, 1024 }
  0xe7   : > { %3878 = dma.hbm_to_vmem [thread:$0]  (!%p4923_p13), %s4933_s0, 512, %s4917_s16, %s4935_s5, %s5772_s20, %s5772_s20, %s5771_s27  }
  0xe8   : > { %p4361_p1 = scmp.ne.s32.totalorder %s4819_s15, %s4360_s23  ;;  %s4365_s19 = scalar_lea.hbm %s5700_s2, 2048 }
  0xe9   : > { %p4366_p9 = scmp.lt.u32.totalorder %s4819_s15, %s5700_s2  ;;  %p4367_p7 = scmp.lt.u32.totalorder %s4365_s19, %s4360_s23 }
  0xea   : > { %p4369_p5 = scmp.lt.u32.totalorder %s4360_s23, %s4819_s15 }
  0xeb   : > { %p4368_p2 = por %p4367_p7, %p4366_p9 }
  0xec   : > { %p5793_p3 = scmp.ne.s32.totalorder %s5792_s9, 0 }
  0xed   : > { %p4370_p12 = por %p4369_p5, %p4368_p2 }
  0xee   : > { %p5794_p0 = pneg %p5793_p3 }
  0xf0   : > { %p4363_p8 = pnand %p4361_p1, %p5794_p0 }
  0xf2   : > { %p4364_p10 = pneg %p4363_p8 }
  0xf4   : > { %p4371_p11 = pnand %p4370_p12, %p4364_p10 }
  0xf6   : > { %4374 = shalt.err (!%p4371_p11)
}
  0xf7   : > { %s4375_s16 = scalar_lea.vmem %s4928_s12, 1024  ;;  %p5795_p4 = pmov %p5794_p0 }
  0xf8   : > { %p4376_p13 = scmp.ne.s32.totalorder %s4928_s12, %s4375_s16  ;;  %s4538_s0 = smov [#allocation8]  }
  0xf9   : > { %s4380_s5 = sshll.u32 %s4538_s0, 4  ;;  %s4381_s5 = int_to_ptr.vmem [resolvable:$false] %s4380_s5 }
  0xfa   : > { %p4378_p1 = pnand %p4376_p13, %p5795_p4  ;;  %s4382_s1 = scalar_lea.vmem %s4381_s5, 2048 }
  0xfb   : > { %p4383_p8 = scmp.lt.s32.totalorder %s4928_s12, %s4381_s5  ;;  %p4384_p9 = scmp.lt.s32.totalorder %s4382_s1, %s4375_s16 }
  0xfc   : > { %p4379_p0 = pneg %p4378_p1 }
  0xfd   : > { %p4385_p7 = por %p4384_p9, %p4383_p8 }
  0xff   : > { %p4386_p2 = pnand %p4385_p7, %p4379_p0 }
 0x101   : > { %4389 = shalt.err (!%p4386_p2)
}
 0x102   : > { %3884 = dma.hbm_to_vmem [thread:$0]  (!%p5793_p3), %s4819_s15, 1024, %s4928_s12, %s4783_s6, %s5772_s20, %s5772_s20, %s5771_s27  }
 0x103   : > { %s5796_s21 = sld [smem:[#allocation31_spill]] }
 0x109   : > { %p5797_p10 = scmp.ne.s32.totalorder %s5796_s21, 0 }
 0x10a   : > { %s4996_s24 = sand.u32 (!%p5797_p10), 1, %s4504_s25  }
 0x10b   : > { %502 = sbr.rel (%p5797_p10) target bundleno = 3627 (0xe2b), region = 64  ;;  %s3066_s23 = sshll.u32 (!%p5797_p10), %s4996_s24, 5 }
 0x10c   : > { %s505_s3 = scalar_lea.sflag (!%p5797_p10), [#allocation4], %s4996_s24  ;;  %s5000_s8 = scalar_lea.vmem (!%p5797_p10), [#allocation3], %s3066_s23 }
 0x112   : > { %4463 = dma.done.wait (%p4888_p6), %s505_s3, 512  }
 0x113   : > { %4465 = vsyncadd (%p4888_p6), %s505_s3, 4294966784  ;;  %s5798_s6 = sld [smem:[#allocation26_spill]]  ;;  %s5799_s27 = sld [smem:[#allocation32_spill]] }
 0x114   : > { %s513_s20 = sand.u32 1, %s4673_s14  }
 0x115   : > { %s514_s9 = scalar_lea.sflag [#allocation7], %s513_s20 }
 0x119   : > { %s515_s15 = sand.u32 1, %s5798_s6   ;;  %p5800_p3 = scmp.ne.s32.totalorder %s5799_s27, 0 }
 0x11a   : > { %s3067_s12 = sshll.u32 %s515_s15, 6 }
 0x11b   : > { %s5008_s19 = scalar_lea.vmem [#allocation6], %s3067_s12 }
 0x11c   : > { %4467 = dma.done.wait (%p5800_p3), %s514_s9, 2048  }
 0x11d   : > { %4469 = vsyncadd (%p5800_p3), %s514_s9, 4294965248  ;;  %s5014_s18 = scalar_lea.vmem [#allocation8], %s3067_s12  ;;  %p5801_p5 = scmp.eq.s32.totalorder %s4673_s14, 0 }
 0x11f   : > { %4471 = dma.done.wait (%p5801_p5), [#allocation10], 2048   ;;  %p5802_p6 = pmov %p5801_p5 }
 0x120   : > { %p5803_p12 = pmov %p5801_p5 }
 0x121   : > { %4473 = vsyncadd (%p5802_p6), [#allocation10], 4294965248 }
 0x122   : > { %4475 = dma.done.wait (%p5803_p12), [#allocation13], 2048   ;;  %p5804_p11 = pmov %p5801_p5 }
 0x123   : > { %v4008_v0 = vld [vmem:[#allocation11] sm:$0xff]   ;;  %v4009_v1 = vld [vmem:[#allocation11 + $0x8] sm:$0xff]   ;;  %v4010_v2 = vld [vmem:[#allocation11 + $0x10] sm:$0xff]   ;;  %s5805_s11 = sld [smem:[#allocation41_spill]]  ;;  %vm1262_vm0 = vcmask 261120   ;;  %s5806_s5 = sld [smem:[#allocation39_spill]] }
 0x124   : > { %4477 = vsyncadd (%p5804_p11), [#allocation13], 4294965248  ;;  %3518 = vmatprep.subr.bf16.mxu1 %v4008_v0  ;;  %v4011_v3 = vld [vmem:[#allocation11 + $0x18] sm:$0xff]   ;;  %v4016_v4 = vld [vmem:[%s5008_s19] sm:$0xff]   ;;  %s4539_s1 = smov 96   ;;  %s5807_s3 = sld [smem:[#allocation43_spill]] }
 0x125   : > { %3519 = vmatpush3.bf16.msra.mxu1 %v4008_v0  ;;  %3534 = vmatprep.mubr.bf16.mxu1 %v4016_v4  ;;  %v4012_v5 = vld [vmem:[#allocation11 + $0x20] sm:$0xff]   ;;  %v4013_v7 = vld [vmem:[#allocation11 + $0x28] sm:$0xff]   ;;  %v4024_v9 = vld [vmem:[#allocation9 + $0x10] sm:$0xff]   ;;  %s4540_s27 = smov 64   ;;  %s4541_s20 = smov 32   ;;  %vm1916_vm1 = vcmask 523520  }
 0x126   : > { %3520 = vmatprep.subr.bf16.mxu1 %v4009_v1  ;;  %v4020_v6 = vld [vmem:[#allocation9] sm:$0xff]   ;;  %v4023_v8 = vld [vmem:[#allocation9 + $0x8] sm:$0xff]   ;;  %v4014_v10 = vld [vmem:[#allocation11 + $0x30] sm:$0xff]   ;;  %vm2268_vm2 = vcmask 785920   ;;  %vm2620_vm3 = vcmask 1048320   ;;  %s5808_s15 = sld [smem:[#allocation29_spill]] }
 0x127   : > { %3494 = vmatprep.subr.bf16.mxu0 %v4020_v6  ;;  %v4025_v11 = vld [vmem:[#allocation9 + $0x18] sm:$0xff]   ;;  %v4026_v13 = vld [vmem:[#allocation9 + $0x20] sm:$0xff]   ;;  %v4029_v15 = vld [vmem:[#allocation9 + $0x28] sm:$0xff]   ;;  %s5809_s12 = sld [smem:[#allocation30_spill]]  ;;  %s3073_s9 = sshll.u32 %s4996_s24, 6 }
 0x128   : > { %3495 = vmatpush3.bf16.msra.mxu0 %v4020_v6  ;;  %v4015_v12 = vld [vmem:[#allocation11 + $0x38] sm:$0xff]   ;;  %v4032_v14 = vld [vmem:[%s5000_s8] sm:$0xff]   ;;  %v4017_v16 = vld [vmem:[%s5008_s19 + $0x8] sm:$0xff]   ;;  %s5810_s14 = sld [smem:[#allocation45_spill]]  ;;  %s590_s4 = scalar_lea.vmem [#allocation15], %s3073_s9 }
 0x129   : > { %3521 = vmatpush3.bf16.msra.mxu1 %v4009_v1  ;;  %3496 = vmatprep.subr.bf16.mxu0 %v4023_v8  ;;  %v4018_v17 = vld [vmem:[%s5008_s19 + $0x10] sm:$0xff]   ;;  %v4031_v19 = vld [vmem:[#allocation9 + $0x38] sm:$0xff]   ;;  %v4021_v21 = vld [vmem:[%s5008_s19 + $0x20] sm:$0xff]   ;;  %p5812_p4 = scmp.ne.s32.totalorder %s5785_s10, 0  ;;  %s4542_s9 = smov [#allocation15]  }
 0x12a   : > { %3522 = vmatprep.subr.bf16.mxu1 %v4010_v2  ;;  %3510 = vmatprep.mubr.bf16.mxu0 %v4032_v14  ;;  %v4030_v18 = vld [vmem:[#allocation9 + $0x30] sm:$0xff]   ;;  %v4019_v20 = vld [vmem:[%s5008_s19 + $0x18] sm:$0xff]   ;;  %v4033_v22 = vld [vmem:[%s5000_s8 + $0x8] sm:$0xff]  }
 0x12b   : > { %v4034_v23 = vld [vmem:[%s5000_s8 + $0x10] sm:$0xff]   ;;  %v4022_v24 = vld [vmem:[%s5008_s19 + $0x28] sm:$0xff]   ;;  %v4035_v26 = vld [vmem:[%s5000_s8 + $0x18] sm:$0xff]   ;;  %s3074_s8 = sshll.u32 %s4996_s24, 7 }
 0x12c   : > { %3497 = vmatpush3.bf16.msra.mxu0 %v4023_v8  ;;  %v4027_v25 = vld [vmem:[%s5008_s19 + $0x30] sm:$0xff]   ;;  %v4028_v27 = vld [vmem:[%s5008_s19 + $0x38] sm:$0xff]   ;;  %v5039_v29 = vld [vmem:[%s5805_s11] ss:$0 sm:$0xff]  ;;  %s5269_s6 = scalar_lea.vmem [#allocation16], %s3074_s8  ;;  %s3205_s11 = sshll.u32 %s5808_s15, 3 }
 0x12d   : > { %3523 = vmatpush3.bf16.msra.mxu1 %v4010_v2  ;;  %3498 = vmatprep.subr.bf16.mxu0 %v4024_v9  ;;  %v3075_v45 = vld [vmem:[%s5806_s5] ss:$0 sm:$0xff]  ;;  %s3206_s16 = sshll.u32 %s5809_s12, 4  ;;  %s2794_s5 = sshll.u32 %s590_s4, 4  ;;  %s5608_s5 = int_to_ptr.vmem [resolvable:$true] %s2794_s5 }
 0x12e   : > { %3524 = vmatprep.subr.bf16.mxu1 %v4011_v3  ;;  %s2791_s0 = sadd.s32 %s3206_s16, %s3205_s11  ;;  %s4394_s19 = sshll.u32 %s4542_s9, 4  ;;  %s4395_s19 = int_to_ptr.vmem [resolvable:$false] %s4394_s19 }
 0x12f   : > { %p4397_p8 = scmp.lt.s32.totalorder %s5608_s5, %s4395_s19 }
 0x130   : > { %3499 = vmatpush3.bf16.msra.mxu0 %v4024_v9 }
 0x131   : > { %3525 = vmatpush3.bf16.msra.mxu1 %v4011_v3  ;;  %3500 = vmatprep.subr.bf16.mxu0 %v4025_v11 }
 0x132   : > { %3526 = vmatprep.subr.bf16.mxu1 %v4012_v5 }
 0x134   : > { %3501 = vmatpush3.bf16.msra.mxu0 %v4025_v11 }
 0x135   : > { %3527 = vmatpush3.bf16.msra.mxu1 %v4012_v5  ;;  %3502 = vmatprep.subr.bf16.mxu0 %v4026_v13 }
 0x136   : > { %3528 = vmatprep.subr.bf16.mxu1 %v4013_v7 }
 0x138   : > { %3503 = vmatpush3.bf16.msra.mxu0 %v4026_v13 }
 0x139   : > { %3529 = vmatpush3.bf16.msra.mxu1 %v4013_v7  ;;  %3504 = vmatprep.subr.bf16.mxu0 %v4029_v15 }
 0x13a   : > { %3530 = vmatprep.subr.bf16.mxu1 %v4014_v10 }
 0x13c   : > { %3505 = vmatpush3.bf16.msra.mxu0 %v4029_v15 }
 0x13d   : > { %3531 = vmatpush3.bf16.msra.mxu1 %v4014_v10  ;;  %3506 = vmatprep.subr.bf16.mxu0 %v4030_v18 }
 0x13e   : > { %3532 = vmatprep.subr.bf16.mxu1 %v4015_v12 }
 0x140   : > { %3507 = vmatpush3.bf16.msra.mxu0 %v4030_v18 }
 0x141   : > { %3533 = vmatpush3.bf16.msra.mxu1 %v4015_v12  ;;  %3508 = vmatprep.subr.bf16.mxu0 %v4031_v19 }
 0x144   : > { %3535 = vmatmul.mubr.bf16.vlgmr.msra.gmra.mrb[0].mxu1 %v4017_v16  ;;  %3509 = vmatpush3.bf16.msra.mxu0 %v4031_v19 }
 0x145   : > { %3538 = vmatprep.mubr.bf16.mxu1 %v4018_v17 }
 0x147   : > { %3511 = vmatmul.mubr.bf16.vlgmr.msra.gmra.mrb[0].mxu0 %v4033_v22 }
 0x148   : > { %3514 = vmatprep.mubr.bf16.mxu0 %v4034_v23 }
 0x14c   : > { %3539 = vmatmul.mubr.bf16.gmra.mrb[4].mxu1 %v4019_v20 }
 0x14d   : > { %3542 = vmatprep.mubr.bf16.mxu1 %v4021_v21 }
 0x14f   : > { %3515 = vmatmul.mubr.bf16.gmra.mrb[4].mxu0 %v4035_v26 }
 0x154   : > { %3543 = vmatmul.mubr.bf16.gmra.mrb[8].mxu1 %v4022_v24 }
 0x155   : > { %3546 = vmatprep.mubr.bf16.mxu1 %v4027_v25 }
 0x15c   : > { %3547 = vmatmul.mubr.bf16.gmra.mrb[12].mxu1 %v4028_v27 }
 0x217   : > { %v3536_v28 = vpop.f32.mrb[0].mxu1 }
 0x218   : > { %v955_v30 = vpop.f32.mrb[1].mxu1  ;;  %v964_v32 = vadd.f32 %v3536_v28, %v5039_v29 }
 0x219   : > { %v3537_v31 = vpop.f32.mrb[2].mxu1  ;;  %v956_v35 = vadd.f32 %v5039_v29, %v955_v30 }
 0x21a   : > { %v967_v33 = vadd.f32 %v3537_v31, %v5039_v29  ;;  %v958_v34 = vpop.f32.mrb[3].mxu1  ;;  %v3512_v49 = vpop.f32.mrb[0].mxu0 }
 0x21b   : > { %v959_v36 = vadd.f32 %v5039_v29, %v958_v34  ;;  %v780_v51 = vadd.f32 %v3512_v49, %v3075_v45  ;;  %v771_v52 = vpop.f32.mrb[1].mxu0  ;;  %v4041_v49 = vld [vmem:[#allocation12 + $0x28] sm:$0xff]  }
 0x21c   : > { %v5045_v37 = vpack.c.bf16 %v967_v33, %v964_v32  ;;  %v772_v54 = vadd.f32 %v3075_v45, %v771_v52  ;;  %v3513_v55 = vpop.f32.mrb[2].mxu0  ;;  %v4042_v52 = vld [vmem:[#allocation12 + $0x30] sm:$0xff]  }
 0x21d   : > { %v5047_v38 = vpack.c.bf16 %v959_v36, %v956_v35  ;;  %v1236_v56 = vmul.f32 0.17677669, %v780_v51  ;;  %v783_v57 = vadd.f32 %v3513_v55, %v3075_v45  ;;  %v774_v58 = vpop.f32.mrb[3].mxu0  ;;  %v4044_v51 = vld [vmem:[%s5014_s18] sm:$0xff]   ;;  %v4045_v55 = vld [vmem:[%s5014_s18 + $0x8] sm:$0xff]  }
 0x21e   : > { %v1279_v59 = vsel %vm1262_vm0, %v5045_v37, 0  ;;  %v1234_v61 = vmul.f32 0.17677669, %v772_v54  ;;  %v775_v62 = vadd.f32 %v3075_v45, %v774_v58  ;;  %3566 = vmatprep.mubr.bf16.mxu0 %v4044_v51  ;;  %v4043_v54 = vld [vmem:[#allocation12 + $0x38] sm:$0xff]   ;;  %v4048_v58 = vld [vmem:[%s5014_s18 + $0x20] sm:$0xff]  }
 0x21f   : > { %3798 = vmatprep.subr.msk.bf16.mxu1 %vm1262_vm0, %v5047_v38  ;;  %v1276_v39 = vsel %vm1262_vm0, %v5047_v38, 0  ;;  %v3540_v40 = vpop.f32.mrb[4].mxu1  ;;  %v1237_v1 = vmul.f32 0.17677669, %v783_v57  ;;  %v4047_v57 = vld [vmem:[%s5014_s18 + $0x18] sm:$0xff]  }
 0x220   : > { %3583 = vmatpush3.bf16.xpose.msra.mxu1 %v1276_v39  ;;  %v980_v41 = vadd.f32 %v3540_v40, %v5039_v29  ;;  %v971_v42 = vpop.f32.mrb[5].mxu1  ;;  %v1235_v4 = vmul.f32 0.17677669, %v775_v62 }
 0x221   : > { %3799 = vmatprep.subr.msk.bf16.mxu1 %vm1262_vm0, %v5045_v37  ;;  %v972_v43 = vadd.f32 %v5039_v29, %v971_v42  ;;  %v3541_v44 = vpop.f32.mrb[6].mxu1  ;;  %v5073_v7 = vpack.c.bf16 %v1237_v1, %v1236_v56  ;;  %v4046_v56 = vld [vmem:[%s5014_s18 + $0x10] sm:$0xff]  }
 0x222   : > { %v983_v46 = vadd.f32 %v3541_v44, %v5039_v29  ;;  %v974_v47 = vpop.f32.mrb[7].mxu1  ;;  %v5076_v9 = vpack.c.bf16 %v1235_v4, %v1234_v61  ;;  %v3516_v10 = vpop.f32.mrb[4].mxu0  ;;  %v4036_v44 = vld [vmem:[#allocation12] sm:$0xff]   ;;  %v4051_v61 = vld [vmem:[%s5014_s18 + $0x38] sm:$0xff]  }
 0x223   : > { %v975_v48 = vadd.f32 %v5039_v29, %v974_v47  ;;  %v796_v12 = vadd.f32 %v3516_v10, %v3075_v45  ;;  %v787_v13 = vpop.f32.mrb[5].mxu0  ;;  %3550 = vmatprep.subr.bf16.mxu0 %v4036_v44  ;;  %v4039_v47 = vld [vmem:[#allocation12 + $0x18] sm:$0xff]  }
 0x224   : > { %v5062_v50 = vpack.c.bf16 %v983_v46, %v980_v41  ;;  %3598 = vmatprep.mubr.msk.bf16.mxu1 %vm1262_vm0, %v5076_v9  ;;  %v788_v15 = vadd.f32 %v3075_v45, %v787_v13  ;;  %v3517_v16 = vpop.f32.mrb[6].mxu0  ;;  %3551 = vmatpush3.bf16.msra.mxu0 %v4036_v44  ;;  %v4038_v46 = vld [vmem:[#allocation12 + $0x10] sm:$0xff]  }
 0x225   : > { %v5064_v53 = vpack.c.bf16 %v975_v48, %v972_v43  ;;  %v1240_v17 = vmul.f32 0.17677669, %v796_v12  ;;  %v799_v18 = vadd.f32 %v3517_v16, %v3075_v45  ;;  %v790_v19 = vpop.f32.mrb[7].mxu0  ;;  %v4040_v48 = vld [vmem:[#allocation12 + $0x20] sm:$0xff]  }
 0x226   : > { %v1238_v22 = vmul.f32 0.17677669, %v788_v15  ;;  %v791_v23 = vadd.f32 %v3075_v45, %v790_v19  ;;  %v1285_v40 = vsel %vm1262_vm0, %v5062_v50, 0  ;;  %v4037_v45 = vld [vmem:[#allocation12 + $0x8] sm:$0xff]  }
 0x227   : > { %v3544_v60 = vpop.f32.mrb[8].mxu1  ;;  %v1282_v20 = vsel %vm1262_vm0, %v5064_v53, 0  ;;  %v1241_v26 = vmul.f32 0.17677669, %v799_v18  ;;  %3552 = vmatprep.subr.bf16.mxu0 %v4037_v45 }
 0x228   : > { %3585 = vmatpush3.bf16.xpose.msra.mxu1 %v1279_v59  ;;  %v996_v63 = vadd.f32 %v3544_v60, %v5039_v29  ;;  %v987_v0 = vpop.f32.mrb[9].mxu1  ;;  %v1239_v30 = vmul.f32 0.17677669, %v791_v23  ;;  %3553 = vmatpush3.bf16.msra.mxu0 %v4037_v45  ;;  %v4049_v59 = vld [vmem:[%s5014_s18 + $0x28] sm:$0xff]   ;;  %v4050_v60 = vld [vmem:[%s5014_s18 + $0x30] sm:$0xff]   ;;  %s4396_s18 = scalar_lea.vmem %s4395_s19, 2048 }
 0x229   : > { %3800 = vmatprep.subr.msk.bf16.mxu1 %vm1262_vm0, %v5064_v53  ;;  %v988_v2 = vadd.f32 %v5039_v29, %v987_v0  ;;  %v3545_v3 = vpop.f32.mrb[10].mxu1  ;;  %v5091_v33 = vpack.c.bf16 %v1241_v26, %v1240_v17  ;;  %3554 = vmatprep.subr.bf16.mxu0 %v4038_v46 }
 0x22a   : > { %v999_v5 = vadd.f32 %v3545_v3, %v5039_v29  ;;  %v990_v6 = vpop.f32.mrb[11].mxu1  ;;  %v5094_v35 = vpack.c.bf16 %v1239_v30, %v1238_v22 }
 0x22b   : > { %v991_v8 = vadd.f32 %v5039_v29, %v990_v6  ;;  %v5153_v6 = vld [vmem:[%s5807_s3] ss:$0 sm:$0xff]  ;;  %s5811_s3 = sld [smem:[#allocation46_spill]] }
 0x22c   : > { %v5078_v11 = vpack.c.bf16 %v999_v5, %v996_v63  ;;  %3555 = vmatpush3.bf16.msra.mxu0 %v4038_v46 }
 0x22d   : > { %v5080_v14 = vpack.c.bf16 %v991_v8, %v988_v2  ;;  %3556 = vmatprep.subr.bf16.mxu0 %v4039_v47 }
 0x22f   : > { %v3548_v21 = vpop.f32.mrb[12].mxu1  ;;  %v1288_v41 = vsel %vm1262_vm0, %v5080_v14, 0 }
 0x230   : > { %3587 = vmatpush3.bf16.xpose.msra.mxu1 %v1282_v20  ;;  %v1012_v24 = vadd.f32 %v3548_v21, %v5039_v29  ;;  %v1003_v25 = vpop.f32.mrb[13].mxu1  ;;  %3557 = vmatpush3.bf16.msra.mxu0 %v4039_v47 }
 0x231   : > { %3801 = vmatprep.subr.msk.bf16.mxu1 %vm1262_vm0, %v5062_v50  ;;  %v1004_v27 = vadd.f32 %v5039_v29, %v1003_v25  ;;  %v3549_v28 = vpop.f32.mrb[14].mxu1  ;;  %3558 = vmatprep.subr.bf16.mxu0 %v4040_v48 }
 0x232   : > { %v1015_v31 = vadd.f32 %v3549_v28, %v5039_v29  ;;  %v1006_v32 = vpop.f32.mrb[15].mxu1 }
 0x233   : > { %v1007_v34 = vadd.f32 %v5039_v29, %v1006_v32  ;;  %v1291_v29 = vsel %vm1262_vm0, %v5078_v11, 0 }
 0x234   : > { %v5096_v36 = vpack.c.bf16 %v1015_v31, %v1012_v24  ;;  %3559 = vmatpush3.bf16.msra.mxu0 %v4040_v48 }
 0x235   : > { %v5098_v39 = vpack.c.bf16 %v1007_v34, %v1004_v27  ;;  %3560 = vmatprep.subr.bf16.mxu0 %v4041_v49 }
 0x236   : > { %v1297_v43 = vsel %vm1262_vm0, %v5096_v36, 0 }
 0x237   : > { %v1294_v42 = vsel %vm1262_vm0, %v5098_v39, 0 }
 0x238   : > { %3589 = vmatpush3.bf16.xpose.msra.mxu1 %v1285_v40  ;;  %3561 = vmatpush3.bf16.msra.mxu0 %v4041_v49 }
 0x239   : > { %3802 = vmatprep.subr.msk.bf16.mxu1 %vm1262_vm0, %v5080_v14  ;;  %3562 = vmatprep.subr.bf16.mxu0 %v4042_v52 }
 0x23c   : > { %3563 = vmatpush3.bf16.msra.mxu0 %v4042_v52 }
 0x23d   : > { %3564 = vmatprep.subr.bf16.mxu0 %v4043_v54 }
 0x240   : > { %3591 = vmatpush3.bf16.xpose.msra.mxu1 %v1288_v41  ;;  %3565 = vmatpush3.bf16.msra.mxu0 %v4043_v54 }
 0x241   : > { %3803 = vmatprep.subr.msk.bf16.mxu1 %vm1262_vm0, %v5078_v11 }
 0x243   : > { %3567 = vmatmul.mubr.bf16.vlgmr.msra.gmra.mrb[8].mxu0 %v4045_v55 }
 0x244   : > { %3570 = vmatprep.mubr.bf16.mxu0 %v4046_v56 }
 0x248   : > { %3593 = vmatpush3.bf16.xpose.msra.mxu1 %v1291_v29 }
 0x249   : > { %3804 = vmatprep.subr.msk.bf16.mxu1 %vm1262_vm0, %v5098_v39 }
 0x24b   : > { %3571 = vmatmul.mubr.bf16.gmra.mrb[12].mxu0 %v4047_v57 }
 0x24c   : > { %3574 = vmatprep.mubr.bf16.mxu0 %v4048_v58 }
 0x250   : > { %3595 = vmatpush3.bf16.xpose.msra.mxu1 %v1294_v42 }
 0x251   : > { %3805 = vmatprep.subr.msk.bf16.mxu1 %vm1262_vm0, %v5096_v36 }
 0x253   : > { %3575 = vmatmul.mubr.bf16.gmra.mrb[16].mxu0 %v4049_v59 }
 0x254   : > { %3578 = vmatprep.mubr.bf16.mxu0 %v4050_v60 }
 0x258   : > { %3597 = vmatpush3.bf16.xpose.msra.mxu1 %v1297_v43 }
 0x25b   : > { %3579 = vmatmul.mubr.bf16.gmra.mrb[20].mxu0 %v4051_v61 }
 0x25f   : > { %3599 = vmatmul.mubr.msk.bf16.vlgmr.msra.gmra.mrb[16].mxu1 %vm1262_vm0, %v5073_v7 }
 0x260   : > { %3602 = vmatprep.mubr.msk.bf16.mxu1 %vm1262_vm0, %v5094_v35 }
 0x267   : > { %3603 = vmatmul.mubr.msk.bf16.gmra.mrb[20].mxu1 %vm1262_vm0, %v5091_v33 }
 0x316   : > { %v3568_v8 = vpop.f32.mrb[8].mxu0 }
 0x317   : > { %v1180_v12 = vadd.f32 %v3568_v8, %v5153_v6  ;;  %v1171_v13 = vpop.f32.mrb[9].mxu0 }
 0x318   : > { %v1172_v17 = vadd.f32 %v5153_v6, %v1171_v13  ;;  %v3569_v18 = vpop.f32.mrb[10].mxu0 }
 0x319   : > { %v1183_v20 = vadd.f32 %v3569_v18, %v5153_v6  ;;  %v1174_v21 = vpop.f32.mrb[11].mxu0 }
 0x31a   : > { %v1175_v23 = vadd.f32 %v5153_v6, %v1174_v21 }
 0x31b   : > { %v5159_v26 = vpack.c.bf16 %v1183_v20, %v1180_v12 }
 0x31c   : > { %v5161_v30 = vpack.c.bf16 %v1175_v23, %v1172_v17 }
 0x31e   : > { %v3572_v34 = vpop.f32.mrb[12].mxu0  ;;  %3606 = vmatprep.subr.bf16.mxu0 %v5161_v30 }
 0x31f   : > { %v1196_v40 = vadd.f32 %v3572_v34, %v5153_v6  ;;  %v1187_v41 = vpop.f32.mrb[13].mxu0  ;;  %3607 = vmatpush3.bf16.msra.mxu0 %v5161_v30 }
 0x320   : > { %v1188_v42 = vadd.f32 %v5153_v6, %v1187_v41  ;;  %v3573_v43 = vpop.f32.mrb[14].mxu0  ;;  %3608 = vmatprep.subr.bf16.mxu0 %v5159_v26 }
 0x321   : > { %v1199_v44 = vadd.f32 %v3573_v43, %v5153_v6  ;;  %v1190_v45 = vpop.f32.mrb[15].mxu0 }
 0x322   : > { %v1191_v46 = vadd.f32 %v5153_v6, %v1190_v45 }
 0x323   : > { %v5170_v47 = vpack.c.bf16 %v1199_v44, %v1196_v40  ;;  %3609 = vmatpush3.bf16.msra.mxu0 %v5159_v26 }
 0x324   : > { %v5173_v48 = vpack.c.bf16 %v1191_v46, %v1188_v42 }
 0x326   : > { %v3576_v51 = vpop.f32.mrb[16].mxu0  ;;  %3610 = vmatprep.subr.bf16.mxu0 %v5173_v48 }
 0x327   : > { %v1212_v52 = vadd.f32 %v3576_v51, %v5153_v6  ;;  %v1203_v54 = vpop.f32.mrb[17].mxu0  ;;  %3611 = vmatpush3.bf16.msra.mxu0 %v5173_v48 }
 0x328   : > { %v1204_v55 = vadd.f32 %v5153_v6, %v1203_v54  ;;  %v3577_v56 = vpop.f32.mrb[18].mxu0  ;;  %3612 = vmatprep.subr.bf16.mxu0 %v5170_v47 }
 0x329   : > { %v1215_v58 = vadd.f32 %v3577_v56, %v5153_v6  ;;  %v1206_v59 = vpop.f32.mrb[19].mxu0 }
 0x32a   : > { %v1207_v61 = vadd.f32 %v5153_v6, %v1206_v59 }
 0x32b   : > { %3613 = vmatpush3.bf16.msra.mxu0 %v5170_v47 }
 0x332   : > { %v3600_v62 = vpop.f32.mrb[16].mxu1 }
 0x333   : > { %1368 = vmax.xlane.f32.xlu1 %v3600_v62  ;;  %v1333_v63 = vpop.f32.mrb[17].mxu1 }
 0x334   : > { %1364 = vmax.xlane.f32.xlu0 %v1333_v63  ;;  %v3601_v0 = vpop.f32.mrb[18].mxu1 }
 0x335   : > { %v1336_v1 = vpop.f32.mrb[19].mxu1 }
 0x337   : > { %1370 = vmax.xlane.f32.xlu1 %v3601_v0 }
 0x338   : > { %1366 = vmax.xlane.f32.xlu0 %v1336_v1 }
 0x33a   : > { %v5132_v2 = vpop.f32.mrb[20].mxu1 }
 0x33b   : > { %v5134_v3 = vpop.f32.mrb[21].mxu1 }
 0x33c   : > { %1376 = vmax.xlane.f32.xlu0 %v5132_v2  ;;  %v5137_v4 = vpop.f32.mrb[22].mxu1 }
 0x33d   : > { %1378 = vmax.xlane.f32.xlu1 %v5137_v4  ;;  %v5140_v5 = vpop.f32.mrb[23].mxu1 }
 0x340   : > { %1372 = vmax.xlane.f32.xlu0 %v5134_v3 }
 0x341   : > { %1374 = vmax.xlane.f32.xlu1 %v5140_v5 }
 0x352   : > { %1571 = vrot.lane.b32.xlu1 %v5045_v37, %s4539_s1 }
 0x356   : > { %1573 = vrot.lane.b32.xlu1 %v5064_v53, %s4539_s1 }
 0x35a   : > { %1575 = vrot.lane.b32.xlu1 %v5062_v50, %s4539_s1 }
 0x3c0   : > { %v1369_v10 = vpop.xlane.xlu1 %1368 }
 0x3c1   : > { %v1382_v15 = vsub.f32 %v3600_v62, %v1369_v10  ;;  %v1365_v16 = vpop.xlane.xlu0 %1364  ;;  %v5191_v62 = vpack.c.bf16 %v1215_v58, %v1212_v52 }
 0x3c2   : > { %v1380_v19 = vsub.f32 %v1333_v63, %v1365_v16  ;;  %v5193_v63 = vpack.c.bf16 %v1207_v61, %v1204_v55 }
 0x3c3   : > { %v1392_v22 = vmul.f32 1.442695, %v1382_v15 }
 0x3c4   : > { %v1388_v24 = vmul.f32 1.442695, %v1380_v19  ;;  %v1371_v25 = vpop.xlane.xlu1 %1370  ;;  %3614 = vmatprep.subr.bf16.mxu0 %v5193_v63 }
 0x3c5   : > { %4060 = vpow2.f32 %v1392_v22  ;;  %v1383_v27 = vsub.f32 %v3601_v0, %v1371_v25  ;;  %v1367_v28 = vpop.xlane.xlu0 %1366  ;;  %3615 = vmatpush3.bf16.msra.mxu0 %v5193_v63 }
 0x3c6   : > { %v1381_v31 = vsub.f32 %v1336_v1, %v1367_v28  ;;  %4062 = vpow2.f32 %v1388_v24  ;;  %v3580_v1 = vpop.f32.mrb[20].mxu0  ;;  %3616 = vmatprep.subr.bf16.mxu0 %v5191_v62 }
 0x3c7   : > { %v1394_v32 = vmul.f32 1.442695, %v1383_v27  ;;  %v1228_v8 = vadd.f32 %v3580_v1, %v5153_v6  ;;  %v1219_v10 = vpop.f32.mrb[21].mxu0 }
 0x3c8   : > { %v1390_v29 = vmul.f32 1.442695, %v1381_v31  ;;  %v1220_v12 = vadd.f32 %v5153_v6, %v1219_v10  ;;  %v3581_v13 = vpop.f32.mrb[22].mxu0 }
 0x3c9   : > { %4064 = vpow2.f32 %v1394_v32  ;;  %v1231_v15 = vadd.f32 %v3581_v13, %v5153_v6  ;;  %v1222_v16 = vpop.f32.mrb[23].mxu0  ;;  %3617 = vmatpush3.bf16.msra.mxu0 %v5191_v62 }
 0x3ca   : > { %4066 = vpow2.f32 %v1390_v29  ;;  %v1223_v17 = vadd.f32 %v5153_v6, %v1222_v16  ;;  %v1377_v6 = vpop.xlane.xlu0 %1376  ;;  %v1379_v20 = vpop.xlane.xlu1 %1378 }
 0x3cb   : > { %v5206_v18 = vpack.c.bf16 %v1231_v15, %v1228_v8  ;;  %v1386_v21 = vsub.f32 %v5132_v2, %v1377_v6  ;;  %v1387_v27 = vsub.f32 %v5137_v4, %v1379_v20 }
 0x3cc   : > { %v5208_v19 = vpack.c.bf16 %v1223_v17, %v1220_v12 }
 0x3cd   : > { %v1400_v23 = vmul.f32 1.442695, %v1386_v21  ;;  %v1402_v32 = vmul.f32 1.442695, %v1387_v27 }
 0x3ce   : > { %3618 = vmatprep.subr.bf16.mxu0 %v5208_v19  ;;  %v1373_v22 = vpop.xlane.xlu0 %1372  ;;  %v1375_v25 = vpop.xlane.xlu1 %1374 }
 0x3cf   : > { %v5175_v49 = vpop.eup %4060  ;;  %3619 = vmatpush3.bf16.msra.mxu0 %v5208_v19  ;;  %v1384_v24 = vsub.f32 %v5134_v3, %v1373_v22  ;;  %4068 = vpow2.f32 %v1400_v23  ;;  %v1385_v31 = vsub.f32 %v5140_v5, %v1375_v25 }
 0x3d0   : > { %1408 = vadd.xlane.f32.xlu0 %v5175_v49  ;;  %v5183_v57 = vpop.eup %4062  ;;  %3620 = vmatprep.subr.bf16.mxu0 %v5206_v18 }
 0x3d1   : > { %v1396_v28 = vmul.f32 1.442695, %v1384_v24  ;;  %v1398_v34 = vmul.f32 1.442695, %v1385_v31 }
 0x3d2   : > { %v1572_v5 = vpop.permute.xlu1 %1571 }
 0x3d3   : > { %v5186_v60 = vpop.eup %4064  ;;  %3621 = vmatpush3.bf16.msra.mxu0 %v5206_v18  ;;  %4070 = vpow2.f32 %v1396_v28 }
 0x3d4   : > { %1404 = vadd.xlane.f32.xlu0 %v5183_v57  ;;  %1410 = vadd.xlane.f32.xlu1 %v5186_v60  ;;  %v5196_v0 = vpop.eup %4066  ;;  %4072 = vpow2.f32 %v1402_v32 }
 0x3d5   : > { %4074 = vpow2.f32 %v1398_v34 }
 0x3d6   : > { %v1574_v41 = vpop.permute.xlu1 %1573 }
 0x3d8   : > { %1406 = vadd.xlane.f32.xlu1 %v5196_v0 }
 0x3d9   : > { %v5225_v40 = vpop.eup %4068 }
 0x3da   : > { %v1576_v29 = vpop.permute.xlu1 %1575 }
 0x3dd   : > { %v5228_v2 = vpop.eup %4070 }
 0x3de   : > { %v5231_v3 = vpop.eup %4072 }
 0x3df   : > { %v5233_v4 = vpop.eup %4074 }
 0x3e9   : > { %1579 = vrot.lane.b32.xlu1 %v5078_v11, %s4539_s1 }
 0x3ea   : > { %1569 = vrot.lane.b32.xlu0 %v5047_v38, %s4539_s1 }
 0x3ed   : > { %1581 = vrot.lane.b32.xlu1 %v5098_v39, %s4539_s1 }
 0x409   : > { %1416 = vadd.xlane.f32.xlu0 %v5225_v40 }
 0x40d   : > { %1412 = vadd.xlane.f32.xlu0 %v5228_v2 }
 0x411   : > { %1418 = vadd.xlane.f32.xlu0 %v5231_v3  ;;  %1414 = vadd.xlane.f32.xlu1 %v5233_v4 }
 0x422   : > { %1583 = vrot.lane.b32.xlu1 %v5096_v36, %s4539_s1 }
 0x426   : > { %1555 = vrot.lane.b32.xlu1 %v5073_v7, %s4539_s1 }
 0x427   : > { %1577 = vrot.lane.b32.xlu0 %v5080_v14, %s4539_s1 }
 0x42a   : > { %1559 = vrot.lane.b32.xlu1 %v5091_v33, %s4539_s1 }
 0x42b   : > { %1553 = vrot.lane.b32.xlu0 %v5076_v9, %s4539_s1 }
 0x42e   : > { %1809 = vrot.lane.b32.xlu1 %v5159_v26, %s4539_s1 }
 0x42f   : > { %1557 = vrot.lane.b32.xlu0 %v5094_v35, %s4539_s1 }
 0x432   : > { %1813 = vrot.lane.b32.xlu1 %v5170_v47, %s4539_s1 }
 0x433   : > { %1807 = vrot.lane.b32.xlu0 %v5161_v30, %s4539_s1 }
 0x436   : > { %1817 = vrot.lane.b32.xlu1 %v5191_v62, %s4539_s1 }
 0x437   : > { %1811 = vrot.lane.b32.xlu0 %v5173_v48, %s4539_s1 }
 0x43b   : > { %1815 = vrot.lane.b32.xlu0 %v5193_v63, %s4539_s1 }
 0x43f   : > { %1819 = vrot.lane.b32.xlu0 %v5208_v19, %s4539_s1 }
 0x45d   : > { %v1409_v42 = vpop.xlane.xlu0 %1408 }
 0x45e   : > { %4076 = vrcp.f32 %v1409_v42 }
 0x461   : > { %v1405_v43 = vpop.xlane.xlu0 %1404  ;;  %v1411_v44 = vpop.xlane.xlu1 %1410 }
 0x462   : > { %4078 = vrcp.f32 %v1411_v44 }
 0x463   : > { %4080 = vrcp.f32 %v1405_v43 }
 0x465   : > { %v1570_v45 = vpop.permute.xlu0 %1569  ;;  %v1407_v46 = vpop.xlane.xlu1 %1406 }
 0x466   : > { %4082 = vrcp.f32 %v1407_v46  ;;  %3806 = vmatprep.subr.msk.bf16.mxu0 %vm1262_vm0, %v1570_v45  ;;  %v1598_v10 = vsel %vm1262_vm0, %v1570_v45, 0 }
 0x468   : > { %v4077_v51 = vpop.eup %4076 }
 0x469   : > { %v1430_v55 = vmul.f32 %v4077_v51, %v5175_v49  ;;  %v1601_v49 = vsel %vm1262_vm0, %v1572_v5, 0 }
 0x46c   : > { %v4079_v52 = vpop.eup %4078 }
 0x46d   : > { %v4081_v54 = vpop.eup %4080  ;;  %v1431_v56 = vmul.f32 %v4079_v52, %v5186_v60  ;;  %v1607_v60 = vsel %vm1262_vm0, %v1576_v29, 0 }
 0x46e   : > { %v1428_v61 = vmul.f32 %v4081_v54, %v5183_v57  ;;  %v1604_v57 = vsel %vm1262_vm0, %v1574_v41, 0 }
 0x46f   : > { %v1437_v59 = vpack.c.bf16 %v1431_v56, %v1430_v55 }
 0x470   : > { %v4083_v58 = vpop.eup %4082 }
 0x471   : > { %v1429_v1 = vmul.f32 %v4083_v58, %v5196_v0  ;;  %3327 = vst [vmem:[%s5269_s6 + $0x8] sm:$0xff] %v1437_v59   ;;  %v1580_v0 = vpop.permute.xlu1 %1579 }
 0x473   : > { %v1436_v8 = vpack.c.bf16 %v1429_v1, %v1428_v61 }
 0x475   : > { %3251 = vst [vmem:[%s5269_s6] sm:$0xff] %v1436_v8   ;;  %3622 = vmatprep.mubr.bf16.mxu0 %v1436_v8  ;;  %v1582_v13 = vpop.permute.xlu1 %1581 }
 0x476   : > { %3623 = vmatmul.mubr.bf16.vlgmr.msra.gmra.mrb[24].mxu0 %v1437_v59 }
 0x477   : > { %3631 = vmatpush3.bf16.xpose.msra.mxu0 %v1598_v10 }
 0x478   : > { %3807 = vmatprep.subr.msk.bf16.mxu0 %vm1262_vm0, %v1572_v5 }
 0x47f   : > { %3633 = vmatpush3.bf16.xpose.msra.mxu0 %v1601_v49 }
 0x480   : > { %3808 = vmatprep.subr.msk.bf16.mxu0 %vm1262_vm0, %v1574_v41  ;;  %v1613_v41 = vsel %vm1262_vm0, %v1580_v0, 0 }
 0x487   : > { %3635 = vmatpush3.bf16.xpose.msra.mxu0 %v1604_v57 }
 0x488   : > { %3809 = vmatprep.subr.msk.bf16.mxu0 %vm1262_vm0, %v1576_v29 }
 0x48f   : > { %3637 = vmatpush3.bf16.xpose.msra.mxu0 %v1607_v60 }
 0x496   : > { %v1417_v12 = vpop.xlane.xlu0 %1416 }
 0x497   : > { %4084 = vrcp.f32 %v1417_v12 }
 0x49a   : > { %v1413_v15 = vpop.xlane.xlu0 %1412 }
 0x49b   : > { %4086 = vrcp.f32 %v1413_v15 }
 0x49e   : > { %v1419_v16 = vpop.xlane.xlu0 %1418  ;;  %v1415_v17 = vpop.xlane.xlu1 %1414 }
 0x49f   : > { %4088 = vrcp.f32 %v1419_v16 }
 0x4a0   : > { %4090 = vrcp.f32 %v1415_v17 }
 0x4a1   : > { %v4085_v24 = vpop.eup %4084 }
 0x4a2   : > { %v1578_v6 = vpop.permute.xlu0 %1577  ;;  %v1584_v20 = vpop.permute.xlu1 %1583  ;;  %v1434_v34 = vmul.f32 %v4085_v24, %v5225_v40 }
 0x4a3   : > { %3810 = vmatprep.subr.msk.bf16.mxu0 %vm1262_vm0, %v1578_v6  ;;  %v1610_v21 = vsel %vm1262_vm0, %v1578_v6, 0  ;;  %v1619_v51 = vsel %vm1262_vm0, %v1584_v20, 0 }
 0x4a4   : > { %3639 = vmatpush3.bf16.xpose.msra.mxu0 %v1610_v21 }
 0x4a5   : > { %3811 = vmatprep.subr.msk.bf16.mxu0 %vm1262_vm0, %v1580_v0  ;;  %v4087_v25 = vpop.eup %4086 }
 0x4a6   : > { %v1554_v22 = vpop.permute.xlu0 %1553  ;;  %v1556_v23 = vpop.permute.xlu1 %1555  ;;  %v1432_v29 = vmul.f32 %v4087_v25, %v5228_v2  ;;  %v1616_v2 = vsel %vm1262_vm0, %v1582_v13, 0 }
 0x4a9   : > { %v4089_v27 = vpop.eup %4088 }
 0x4aa   : > { %v4091_v28 = vpop.eup %4090  ;;  %v1558_v31 = vpop.permute.xlu0 %1557  ;;  %v1435_v5 = vmul.f32 %v4089_v27, %v5231_v3 }
 0x4ab   : > { %v1560_v32 = vpop.permute.xlu1 %1559  ;;  %v1433_v42 = vmul.f32 %v4091_v28, %v5233_v4 }
 0x4ac   : > { %3641 = vmatpush3.bf16.xpose.msra.mxu0 %v1613_v41  ;;  %v1439_v43 = vpack.c.bf16 %v1435_v5, %v1434_v34 }
 0x4ad   : > { %3812 = vmatprep.subr.msk.bf16.mxu0 %vm1262_vm0, %v1582_v13  ;;  %v1438_v44 = vpack.c.bf16 %v1433_v42, %v1432_v29 }
 0x4ae   : > { %3329 = vst [vmem:[%s5269_s6 + $0x18] sm:$0xff] %v1439_v43   ;;  %v1808_v45 = vpop.permute.xlu0 %1807 }
 0x4af   : > { %v1810_v46 = vpop.permute.xlu1 %1809  ;;  %3328 = vst [vmem:[%s5269_s6 + $0x10] sm:$0xff] %v1438_v44   ;;  %3626 = vmatprep.mubr.bf16.mxu0 %v1438_v44  ;;  %3654 = vmatprep.subr.bf16.mxu1 %v1808_v45 }
 0x4b0   : > { %3627 = vmatmul.mubr.bf16.gmra.mrb[28].mxu0 %v1439_v43  ;;  %3655 = vmatpush3.bf16.msra.mxu1 %v1808_v45 }
 0x4b1   : > { %3646 = vmatprep.mubr.msk.bf16.mxu0 %vm1262_vm0, %v1554_v22  ;;  %3656 = vmatprep.subr.bf16.mxu1 %v1810_v46 }
 0x4b2   : > { %v1812_v40 = vpop.permute.xlu0 %1811 }
 0x4b3   : > { %v1814_v3 = vpop.permute.xlu1 %1813 }
 0x4b4   : > { %3643 = vmatpush3.bf16.xpose.msra.mxu0 %v1616_v2  ;;  %3657 = vmatpush3.bf16.msra.mxu1 %v1810_v46 }
 0x4b5   : > { %3813 = vmatprep.subr.msk.bf16.mxu0 %vm1262_vm0, %v1584_v20  ;;  %3658 = vmatprep.subr.bf16.mxu1 %v1812_v40 }
 0x4b6   : > { %v1816_v4 = vpop.permute.xlu0 %1815 }
 0x4b7   : > { %v1818_v52 = vpop.permute.xlu1 %1817 }
 0x4b8   : > { %3659 = vmatpush3.bf16.msra.mxu1 %v1812_v40 }
 0x4b9   : > { %3660 = vmatprep.subr.bf16.mxu1 %v1814_v3 }
 0x4ba   : > { %v1820_v54 = vpop.permute.xlu0 %1819 }
 0x4bc   : > { %3645 = vmatpush3.bf16.xpose.msra.mxu0 %v1619_v51  ;;  %3661 = vmatpush3.bf16.msra.mxu1 %v1814_v3 }
 0x4bd   : > { %3662 = vmatprep.subr.bf16.mxu1 %v1816_v4 }
 0x4c0   : > { %3663 = vmatpush3.bf16.msra.mxu1 %v1816_v4 }
 0x4c1   : > { %3664 = vmatprep.subr.bf16.mxu1 %v1818_v52 }
 0x4c3   : > { %3647 = vmatmul.mubr.msk.bf16.vlgmr.msra.gmra.mrb[32].mxu0 %vm1262_vm0, %v1556_v23 }
 0x4c4   : > { %3650 = vmatprep.mubr.msk.bf16.mxu0 %vm1262_vm0, %v1558_v31  ;;  %3665 = vmatpush3.bf16.msra.mxu1 %v1818_v52 }
 0x4c5   : > { %3666 = vmatprep.subr.bf16.mxu1 %v1820_v54 }
 0x4c8   : > { %3667 = vmatpush3.bf16.msra.mxu1 %v1820_v54 }
 0x4cb   : > { %3651 = vmatmul.mubr.msk.bf16.gmra.mrb[36].mxu0 %vm1262_vm0, %v1560_v32 }
 0x549   : > { %v3624_v55 = vpop.f32.mrb[24].mxu0 }
 0x54a   : > { %v1510_v56 = vpop.f32.mrb[25].mxu0 }
 0x54b   : > { %v3625_v58 = vpop.f32.mrb[26].mxu0 }
 0x54c   : > { %v1542_v59 = vpack.c.bf16 %v3625_v58, %v3624_v55  ;;  %v1513_v61 = vpop.f32.mrb[27].mxu0 }
 0x54d   : > { %v1541_v1 = vpack.c.bf16 %v1513_v61, %v1510_v56 }
 0x54e   : > { %1546 = vst.msk [vmem:[#allocation2 + $0x8] sm:$0xff] %vm1262_vm0, %v1542_v59 }
 0x54f   : > { %1545 = vst.msk [vmem:[#allocation2] sm:$0xff] %vm1262_vm0, %v1541_v1 }
 0x583   : > { %v3628_v8 = vpop.f32.mrb[28].mxu0 }
 0x584   : > { %v1526_v10 = vpop.f32.mrb[29].mxu0 }
 0x585   : > { %v3629_v49 = vpop.f32.mrb[30].mxu0 }
 0x586   : > { %v1544_v57 = vpack.c.bf16 %v3629_v49, %v3628_v8  ;;  %v1529_v60 = vpop.f32.mrb[31].mxu0 }
 0x587   : > { %v1543_v0 = vpack.c.bf16 %v1529_v60, %v1526_v10 }
 0x588   : > { %1548 = vst.msk [vmem:[#allocation2 + $0x18] sm:$0xff] %vm1262_vm0, %v1544_v57 }
 0x589   : > { %1547 = vst.msk [vmem:[#allocation2 + $0x10] sm:$0xff] %vm1262_vm0, %v1543_v0 }
 0x596   : > { %v3648_v12 = vpop.f32.mrb[32].mxu0 }
 0x597   : > { %1690 = vmax.xlane.f32.xlu0 %v3648_v12  ;;  %v1655_v13 = vpop.f32.mrb[33].mxu0 }
 0x598   : > { %v3649_v15 = vpop.f32.mrb[34].mxu0 }
 0x599   : > { %v1658_v16 = vpop.f32.mrb[35].mxu0 }
 0x59a   : > { %1688 = vmax.xlane.f32.xlu1 %v1658_v16 }
 0x59b   : > { %1686 = vmax.xlane.f32.xlu0 %v1655_v13 }
 0x59e   : > { %v3652_v17 = vpop.f32.mrb[36].mxu0 }
 0x59f   : > { %1692 = vmax.xlane.f32.xlu0 %v3649_v15  ;;  %v1671_v6 = vpop.f32.mrb[37].mxu0 }
 0x5a0   : > { %v3653_v20 = vpop.f32.mrb[38].mxu0 }
 0x5a1   : > { %v1674_v21 = vpop.f32.mrb[39].mxu0 }
 0x5ab   : > { %1821 = vrot.lane.b32.xlu1 %v5206_v18, %s4539_s1 }
 0x5b5   : > { %1929 = vrot.lane.b32.xlu0 %v5047_v38, %s4540_s27 }
 0x5cf   : > { %1700 = vmax.xlane.f32.xlu1 %v3653_v20 }
 0x5d3   : > { %1696 = vmax.xlane.f32.xlu1 %v1674_v21 }
 0x5d4   : > { %1698 = vmax.xlane.f32.xlu0 %v3652_v17 }
 0x5d8   : > { %1694 = vmax.xlane.f32.xlu0 %v1671_v6 }
 0x5e4   : > { %1931 = vrot.lane.b32.xlu1 %v5045_v37, %s4540_s27 }
 0x624   : > { %v1691_v22 = vpop.xlane.xlu0 %1690 }
 0x625   : > { %v1704_v23 = vsub.f32 %v3648_v12, %v1691_v22 }
 0x627   : > { %v1714_v24 = vmul.f32 1.442695, %v1704_v23  ;;  %v1689_v25 = vpop.xlane.xlu1 %1688 }
 0x628   : > { %v1703_v27 = vsub.f32 %v1658_v16, %v1689_v25  ;;  %v1687_v28 = vpop.xlane.xlu0 %1686 }
 0x629   : > { %4092 = vpow2.f32 %v1714_v24  ;;  %v1702_v31 = vsub.f32 %v1655_v13, %v1687_v28 }
 0x62a   : > { %v1712_v32 = vmul.f32 1.442695, %v1703_v27 }
 0x62b   : > { %v1710_v34 = vmul.f32 1.442695, %v1702_v31  ;;  %v1822_v5 = vpop.permute.xlu1 %1821 }
 0x62c   : > { %4094 = vpow2.f32 %v1712_v32  ;;  %v1693_v41 = vpop.xlane.xlu0 %1692  ;;  %3668 = vmatprep.subr.bf16.mxu1 %v1822_v5 }
 0x62d   : > { %4096 = vpow2.f32 %v1710_v34  ;;  %v1705_v29 = vsub.f32 %v3649_v15, %v1693_v41  ;;  %3669 = vmatpush3.bf16.msra.mxu1 %v1822_v5 }
 0x62f   : > { %v1716_v42 = vmul.f32 1.442695, %v1705_v29 }
 0x630   : > { %v5308_v43 = vpop.permute.xlu0 %1929 }
 0x631   : > { %4098 = vpow2.f32 %v1716_v42  ;;  %3814 = vmatprep.subr.msk.bf16.mxu1 %vm1262_vm0, %v5308_v43  ;;  %v1958_v28 = vsel %vm1262_vm0, %v5308_v43, 0 }
 0x633   : > { %v5312_v44 = vpop.eup %4092 }
 0x634   : > { %1730 = vadd.xlane.f32.xlu1 %v5312_v44 }
 0x636   : > { %v4095_v45 = vpop.eup %4094 }
 0x637   : > { %v4097_v46 = vpop.eup %4096  ;;  %1728 = vadd.xlane.f32.xlu0 %v4095_v45 }
 0x638   : > { %1726 = vadd.xlane.f32.xlu1 %v4097_v46 }
 0x63b   : > { %v4099_v40 = vpop.eup %4098 }
 0x63c   : > { %1732 = vadd.xlane.f32.xlu1 %v4099_v40 }
 0x64d   : > { %1935 = vrot.lane.b32.xlu1 %v5062_v50, %s4540_s27  ;;  %1933 = vrot.lane.b32.xlu0 %v5064_v53, %s4540_s27 }
 0x651   : > { %1939 = vrot.lane.b32.xlu1 %v5078_v11, %s4540_s27 }
 0x655   : > { %1941 = vrot.lane.b32.xlu1 %v5098_v39, %s4540_s27 }
 0x65c   : > { %v1701_v2 = vpop.xlane.xlu1 %1700 }
 0x65d   : > { %v1709_v54 = vsub.f32 %v3653_v20, %v1701_v2 }
 0x65f   : > { %v1724_v61 = vmul.f32 1.442695, %v1709_v54 }
 0x660   : > { %v1697_v51 = vpop.xlane.xlu1 %1696 }
 0x661   : > { %v1699_v3 = vpop.xlane.xlu0 %1698  ;;  %v1707_v56 = vsub.f32 %v1674_v21, %v1697_v51 }
 0x662   : > { %v1708_v4 = vsub.f32 %v3652_v17, %v1699_v3 }
 0x663   : > { %v1720_v1 = vmul.f32 1.442695, %v1707_v56 }
 0x664   : > { %v1722_v52 = vmul.f32 1.442695, %v1708_v4  ;;  %v1932_v60 = vpop.permute.xlu1 %1931 }
 0x665   : > { %v1695_v55 = vpop.xlane.xlu0 %1694  ;;  %v1961_v31 = vsel %vm1262_vm0, %v1932_v60, 0 }
 0x666   : > { %4100 = vpow2.f32 %v1722_v52  ;;  %v1706_v58 = vsub.f32 %v1671_v6, %v1695_v55 }
 0x668   : > { %v1718_v59 = vmul.f32 1.442695, %v1706_v58 }
 0x66a   : > { %4102 = vpow2.f32 %v1718_v59 }
 0x66b   : > { %4104 = vpow2.f32 %v1724_v61 }
 0x66c   : > { %4106 = vpow2.f32 %v1720_v1 }
 0x670   : > { %v5323_v8 = vpop.eup %4100 }
 0x671   : > { %1738 = vadd.xlane.f32.xlu0 %v5323_v8 }
 0x674   : > { %v5326_v10 = vpop.eup %4102 }
 0x675   : > { %1734 = vadd.xlane.f32.xlu0 %v5326_v10  ;;  %v5329_v49 = vpop.eup %4104 }
 0x676   : > { %v5331_v57 = vpop.eup %4106 }
 0x679   : > { %1740 = vadd.xlane.f32.xlu0 %v5329_v49  ;;  %1736 = vadd.xlane.f32.xlu1 %v5331_v57 }
 0x68a   : > { %1943 = vrot.lane.b32.xlu1 %v5096_v36, %s4540_s27 }
 0x68e   : > { %1923 = vrot.lane.b32.xlu1 %v5073_v7, %s4540_s27 }
 0x68f   : > { %1937 = vrot.lane.b32.xlu0 %v5080_v14, %s4540_s27 }
 0x692   : > { %1927 = vrot.lane.b32.xlu1 %v5091_v33, %s4540_s27 }
 0x693   : > { %1921 = vrot.lane.b32.xlu0 %v5076_v9, %s4540_s27 }
 0x696   : > { %2161 = vrot.lane.b32.xlu1 %v5159_v26, %s4540_s27 }
 0x697   : > { %1925 = vrot.lane.b32.xlu0 %v5094_v35, %s4540_s27 }
 0x69a   : > { %2165 = vrot.lane.b32.xlu1 %v5170_v47, %s4540_s27 }
 0x69b   : > { %2159 = vrot.lane.b32.xlu0 %v5161_v30, %s4540_s27 }
 0x69e   : > { %2169 = vrot.lane.b32.xlu1 %v5191_v62, %s4540_s27 }
 0x69f   : > { %2163 = vrot.lane.b32.xlu0 %v5173_v48, %s4540_s27 }
 0x6a3   : > { %2167 = vrot.lane.b32.xlu0 %v5193_v63, %s4540_s27 }
 0x6a7   : > { %2171 = vrot.lane.b32.xlu0 %v5208_v19, %s4540_s27 }
 0x6c1   : > { %v1731_v0 = vpop.xlane.xlu1 %1730 }
 0x6c4   : > { %v1729_v12 = vpop.xlane.xlu0 %1728 }
 0x6c5   : > { %4108 = vrcp.f32 %v1729_v12  ;;  %v1727_v13 = vpop.xlane.xlu1 %1726 }
 0x6c6   : > { %4110 = vrcp.f32 %v1727_v13 }
 0x6c7   : > { %4112 = vrcp.f32 %v1731_v0 }
 0x6c8   : > { %v1934_v32 = vpop.permute.xlu0 %1933 }
 0x6c9   : > { %v1733_v15 = vpop.xlane.xlu1 %1732  ;;  %v1964_v34 = vsel %vm1262_vm0, %v1934_v32, 0 }
 0x6ca   : > { %4114 = vrcp.f32 %v1733_v15 }
 0x6cd   : > { %v1936_v5 = vpop.permute.xlu1 %1935 }
 0x6ce   : > { %v1967_v41 = vsel %vm1262_vm0, %v1936_v5, 0 }
 0x6cf   : > { %v4109_v16 = vpop.eup %4108 }
 0x6d0   : > { %v4111_v17 = vpop.eup %4110  ;;  %v1751_v6 = vmul.f32 %v4109_v16, %v4095_v45 }
 0x6d1   : > { %v1750_v20 = vmul.f32 %v4111_v17, %v4097_v46  ;;  %v4113_v21 = vpop.eup %4112  ;;  %v1940_v29 = vpop.permute.xlu1 %1939 }
 0x6d2   : > { %v1752_v24 = vmul.f32 %v4113_v21, %v5312_v44 }
 0x6d3   : > { %v1758_v22 = vpack.c.bf16 %v1751_v6, %v1750_v20 }
 0x6d4   : > { %v4115_v23 = vpop.eup %4114 }
 0x6d5   : > { %v1753_v25 = vmul.f32 %v4115_v23, %v4099_v40  ;;  %3330 = vst [vmem:[%s5269_s6 + $0x20] sm:$0xff] %v1758_v22   ;;  %3670 = vmatprep.mubr.bf16.mxu1 %v1758_v22  ;;  %v1942_v43 = vpop.permute.xlu1 %1941 }
 0x6d7   : > { %v1759_v27 = vpack.c.bf16 %v1753_v25, %v1752_v24 }
 0x6d9   : > { %3331 = vst [vmem:[%s5269_s6 + $0x28] sm:$0xff] %v1759_v27   ;;  %3671 = vmatmul.mubr.bf16.vlgmr.msra.gmra.mrb[24].mxu1 %v1759_v27 }
 0x6da   : > { %3679 = vmatpush3.bf16.xpose.msra.mxu1 %v1958_v28 }
 0x6db   : > { %3815 = vmatprep.subr.msk.bf16.mxu1 %vm1262_vm0, %v1932_v60  ;;  %v1973_v60 = vsel %vm1262_vm0, %v1940_v29, 0 }
 0x6e2   : > { %3681 = vmatpush3.bf16.xpose.msra.mxu1 %v1961_v31 }
 0x6e3   : > { %3816 = vmatprep.subr.msk.bf16.mxu1 %vm1262_vm0, %v1934_v32 }
 0x6ea   : > { %3683 = vmatpush3.bf16.xpose.msra.mxu1 %v1964_v34 }
 0x6eb   : > { %3817 = vmatprep.subr.msk.bf16.mxu1 %vm1262_vm0, %v1936_v5 }
 0x6f2   : > { %3685 = vmatpush3.bf16.xpose.msra.mxu1 %v1967_v41 }
 0x6fe   : > { %v1739_v42 = vpop.xlane.xlu0 %1738 }
 0x6ff   : > { %4116 = vrcp.f32 %v1739_v42 }
 0x702   : > { %v1735_v44 = vpop.xlane.xlu0 %1734 }
 0x703   : > { %4118 = vrcp.f32 %v1735_v44 }
 0x706   : > { %v1741_v45 = vpop.xlane.xlu0 %1740  ;;  %v1737_v46 = vpop.xlane.xlu1 %1736 }
 0x707   : > { %4120 = vrcp.f32 %v1741_v45 }
 0x708   : > { %4122 = vrcp.f32 %v1737_v46 }
 0x709   : > { %v4117_v52 = vpop.eup %4116 }
 0x70a   : > { %v1938_v40 = vpop.permute.xlu0 %1937  ;;  %v1944_v2 = vpop.permute.xlu1 %1943  ;;  %v1756_v61 = vmul.f32 %v4117_v52, %v5323_v8  ;;  %v1976_v8 = vsel %vm1262_vm0, %v1942_v43, 0 }
 0x70b   : > { %v1970_v3 = vsel %vm1262_vm0, %v1938_v40, 0  ;;  %3818 = vmatprep.subr.msk.bf16.mxu1 %vm1262_vm0, %v1938_v40 }
 0x70c   : > { %3687 = vmatpush3.bf16.xpose.msra.mxu1 %v1970_v3 }
 0x70d   : > { %3819 = vmatprep.subr.msk.bf16.mxu1 %vm1262_vm0, %v1940_v29  ;;  %v4119_v54 = vpop.eup %4118 }
 0x70e   : > { %v1922_v4 = vpop.permute.xlu0 %1921  ;;  %v1924_v51 = vpop.permute.xlu1 %1923  ;;  %v1754_v0 = vmul.f32 %v4119_v54, %v5326_v10 }
 0x711   : > { %v4121_v55 = vpop.eup %4120 }
 0x712   : > { %v4123_v56 = vpop.eup %4122  ;;  %v1926_v58 = vpop.permute.xlu0 %1925  ;;  %v1757_v1 = vmul.f32 %v4121_v55, %v5329_v49 }
 0x713   : > { %v1928_v59 = vpop.permute.xlu1 %1927  ;;  %v1755_v12 = vmul.f32 %v4123_v56, %v5331_v57  ;;  %v1979_v57 = vsel %vm1262_vm0, %v1944_v2, 0 }
 0x714   : > { %3689 = vmatpush3.bf16.xpose.msra.mxu1 %v1973_v60  ;;  %v1761_v13 = vpack.c.bf16 %v1757_v1, %v1756_v61 }
 0x715   : > { %3820 = vmatprep.subr.msk.bf16.mxu1 %vm1262_vm0, %v1942_v43  ;;  %v1760_v15 = vpack.c.bf16 %v1755_v12, %v1754_v0 }
 0x716   : > { %v2160_v16 = vpop.permute.xlu0 %2159  ;;  %3333 = vst [vmem:[%s5269_s6 + $0x38] sm:$0xff] %v1761_v13  }
 0x717   : > { %3332 = vst [vmem:[%s5269_s6 + $0x30] sm:$0xff] %v1760_v15   ;;  %3674 = vmatprep.mubr.bf16.mxu1 %v1760_v15  ;;  %3702 = vmatprep.subr.bf16.mxu0 %v2160_v16  ;;  %v2162_v17 = vpop.permute.xlu1 %2161 }
 0x718   : > { %3675 = vmatmul.mubr.bf16.gmra.mrb[28].mxu1 %v1761_v13  ;;  %3703 = vmatpush3.bf16.msra.mxu0 %v2160_v16 }
 0x719   : > { %3694 = vmatprep.mubr.msk.bf16.mxu1 %vm1262_vm0, %v1922_v4  ;;  %3704 = vmatprep.subr.bf16.mxu0 %v2162_v17 }
 0x71a   : > { %v2164_v10 = vpop.permute.xlu0 %2163 }
 0x71b   : > { %v2166_v49 = vpop.permute.xlu1 %2165 }
 0x71c   : > { %3691 = vmatpush3.bf16.xpose.msra.mxu1 %v1976_v8  ;;  %3705 = vmatpush3.bf16.msra.mxu0 %v2162_v17 }
 0x71d   : > { %3821 = vmatprep.subr.msk.bf16.mxu1 %vm1262_vm0, %v1944_v2  ;;  %3706 = vmatprep.subr.bf16.mxu0 %v2164_v10 }
 0x71e   : > { %v2168_v6 = vpop.permute.xlu0 %2167 }
 0x71f   : > { %v2170_v20 = vpop.permute.xlu1 %2169 }
 0x720   : > { %3707 = vmatpush3.bf16.msra.mxu0 %v2164_v10 }
 0x721   : > { %3708 = vmatprep.subr.bf16.mxu0 %v2166_v49 }
 0x722   : > { %v2172_v21 = vpop.permute.xlu0 %2171 }
 0x724   : > { %3693 = vmatpush3.bf16.xpose.msra.mxu1 %v1979_v57  ;;  %3709 = vmatpush3.bf16.msra.mxu0 %v2166_v49 }
 0x725   : > { %3710 = vmatprep.subr.bf16.mxu0 %v2168_v6 }
 0x728   : > { %3711 = vmatpush3.bf16.msra.mxu0 %v2168_v6 }
 0x729   : > { %3712 = vmatprep.subr.bf16.mxu0 %v2170_v20 }
 0x72b   : > { %3695 = vmatmul.mubr.msk.bf16.vlgmr.msra.gmra.mrb[32].mxu1 %vm1262_vm0, %v1924_v51 }
 0x72c   : > { %3698 = vmatprep.mubr.msk.bf16.mxu1 %vm1262_vm0, %v1926_v58  ;;  %3713 = vmatpush3.bf16.msra.mxu0 %v2170_v20 }
 0x72d   : > { %3714 = vmatprep.subr.bf16.mxu0 %v2172_v21 }
 0x730   : > { %3715 = vmatpush3.bf16.msra.mxu0 %v2172_v21 }
 0x733   : > { %3699 = vmatmul.mubr.msk.bf16.gmra.mrb[36].mxu1 %vm1262_vm0, %v1928_v59 }
 0x7ac   : > { %v5390_v22 = vpop.f32.mrb[24].mxu1 }
 0x7ad   : > { %v5392_v23 = vpop.f32.mrb[25].mxu1 }
 0x7ae   : > { %v5394_v24 = vpop.f32.mrb[26].mxu1 }
 0x7af   : > { %v1897_v25 = vpack.c.bf16 %v5394_v24, %v5390_v22  ;;  %v5398_v27 = vpop.f32.mrb[27].mxu1 }
 0x7b0   : > { %v1896_v28 = vpack.c.bf16 %v5398_v27, %v5392_v23 }
 0x7eb   : > { %v5402_v31 = vpop.f32.mrb[28].mxu1 }
 0x7ec   : > { %v5404_v32 = vpop.f32.mrb[29].mxu1 }
 0x7ed   : > { %v5406_v34 = vpop.f32.mrb[30].mxu1 }
 0x7ee   : > { %v1899_v5 = vpack.c.bf16 %v5406_v34, %v5402_v31  ;;  %v5410_v41 = vpop.f32.mrb[31].mxu1 }
 0x7ef   : > { %v1898_v29 = vpack.c.bf16 %v5410_v41, %v5404_v32 }
 0x7fe   : > { %v3696_v42 = vpop.f32.mrb[32].mxu1 }
 0x7ff   : > { %2050 = vmax.xlane.f32.xlu0 %v3696_v42  ;;  %v2015_v43 = vpop.f32.mrb[33].mxu1 }
 0x800   : > { %v3697_v44 = vpop.f32.mrb[34].mxu1 }
 0x801   : > { %v2018_v45 = vpop.f32.mrb[35].mxu1 }
 0x802   : > { %2048 = vmax.xlane.f32.xlu1 %v2018_v45 }
 0x803   : > { %2046 = vmax.xlane.f32.xlu0 %v2015_v43 }
 0x806   : > { %v3700_v46 = vpop.f32.mrb[36].mxu1 }
 0x807   : > { %2052 = vmax.xlane.f32.xlu0 %v3697_v44  ;;  %v2031_v40 = vpop.f32.mrb[37].mxu1 }
 0x808   : > { %v3701_v2 = vpop.f32.mrb[38].mxu1 }
 0x809   : > { %v2034_v3 = vpop.f32.mrb[39].mxu1 }
 0x813   : > { %2173 = vrot.lane.b32.xlu1 %v5206_v18, %s4540_s27 }
 0x81d   : > { %2281 = vrot.lane.b32.xlu0 %v5047_v38, %s4541_s20 }
 0x837   : > { %2060 = vmax.xlane.f32.xlu1 %v3701_v2 }
 0x83b   : > { %2056 = vmax.xlane.f32.xlu1 %v2034_v3 }
 0x83c   : > { %2058 = vmax.xlane.f32.xlu0 %v3700_v46 }
 0x840   : > { %2054 = vmax.xlane.f32.xlu0 %v2031_v40 }
 0x84c   : > { %2283 = vrot.lane.b32.xlu1 %v5045_v37, %s4541_s20 }
 0x88c   : > { %v2051_v4 = vpop.xlane.xlu0 %2050 }
 0x88d   : > { %v2064_v51 = vsub.f32 %v3696_v42, %v2051_v4 }
 0x88f   : > { %v2074_v52 = vmul.f32 1.442695, %v2064_v51  ;;  %v2049_v54 = vpop.xlane.xlu1 %2048 }
 0x890   : > { %v2063_v55 = vsub.f32 %v2018_v45, %v2049_v54  ;;  %v2047_v56 = vpop.xlane.xlu0 %2046 }
 0x891   : > { %4124 = vpow2.f32 %v2074_v52  ;;  %v2062_v58 = vsub.f32 %v2015_v43, %v2047_v56 }
 0x892   : > { %v2072_v59 = vmul.f32 1.442695, %v2063_v55 }
 0x893   : > { %v2070_v61 = vmul.f32 1.442695, %v2062_v58  ;;  %v2174_v1 = vpop.permute.xlu1 %2173 }
 0x894   : > { %4126 = vpow2.f32 %v2072_v59  ;;  %v2053_v38 = vpop.xlane.xlu0 %2052  ;;  %3716 = vmatprep.subr.bf16.mxu0 %v2174_v1 }
 0x895   : > { %4128 = vpow2.f32 %v2070_v61  ;;  %v2065_v60 = vsub.f32 %v3697_v44, %v2053_v38  ;;  %3717 = vmatpush3.bf16.msra.mxu0 %v2174_v1 }
 0x897   : > { %v2076_v0 = vmul.f32 1.442695, %v2065_v60 }
 0x898   : > { %v5420_v12 = vpop.permute.xlu0 %2281 }
 0x899   : > { %4130 = vpow2.f32 %v2076_v0  ;;  %3822 = vmatprep.subr.msk.bf16.mxu0 %vm1262_vm0, %v5420_v12  ;;  %v2310_v56 = vsel %vm1262_vm0, %v5420_v12, 0 }
 0x89b   : > { %v4125_v37 = vpop.eup %4124 }
 0x89c   : > { %2090 = vadd.xlane.f32.xlu1 %v4125_v37 }
 0x89e   : > { %v4127_v13 = vpop.eup %4126 }
 0x89f   : > { %v4129_v15 = vpop.eup %4128  ;;  %2088 = vadd.xlane.f32.xlu0 %v4127_v13 }
 0x8a0   : > { %2086 = vadd.xlane.f32.xlu1 %v4129_v15 }
 0x8a3   : > { %v4131_v16 = vpop.eup %4130 }
 0x8a4   : > { %2092 = vadd.xlane.f32.xlu1 %v4131_v16 }
 0x8b5   : > { %2287 = vrot.lane.b32.xlu1 %v5062_v50, %s4541_s20  ;;  %2285 = vrot.lane.b32.xlu0 %v5064_v53, %s4541_s20 }
 0x8b9   : > { %2291 = vrot.lane.b32.xlu1 %v5078_v11, %s4541_s20 }
 0x8bd   : > { %2293 = vrot.lane.b32.xlu1 %v5098_v39, %s4541_s20 }
 0x8c4   : > { %v2061_v17 = vpop.xlane.xlu1 %2060 }
 0x8c5   : > { %v2069_v6 = vsub.f32 %v3701_v2, %v2061_v17 }
 0x8c7   : > { %v2084_v43 = vmul.f32 1.442695, %v2069_v6 }
 0x8c8   : > { %v2057_v49 = vpop.xlane.xlu1 %2056 }
 0x8c9   : > { %v2059_v8 = vpop.xlane.xlu0 %2058  ;;  %v2067_v21 = vsub.f32 %v2034_v3, %v2057_v49 }
 0x8ca   : > { %v2068_v10 = vsub.f32 %v3700_v46, %v2059_v8 }
 0x8cb   : > { %v2080_v44 = vmul.f32 1.442695, %v2067_v21 }
 0x8cc   : > { %v2082_v57 = vmul.f32 1.442695, %v2068_v10  ;;  %v2284_v46 = vpop.permute.xlu1 %2283 }
 0x8cd   : > { %v2055_v20 = vpop.xlane.xlu0 %2054  ;;  %v2313_v58 = vsel %vm1262_vm0, %v2284_v46, 0 }
 0x8ce   : > { %4132 = vpow2.f32 %v2082_v57  ;;  %v2066_v42 = vsub.f32 %v2031_v40, %v2055_v20 }
 0x8d0   : > { %v2078_v50 = vmul.f32 1.442695, %v2066_v42 }
 0x8d2   : > { %4134 = vpow2.f32 %v2078_v50 }
 0x8d3   : > { %4136 = vpow2.f32 %v2084_v43 }
 0x8d4   : > { %4138 = vpow2.f32 %v2080_v44 }
 0x8d8   : > { %v5432_v53 = vpop.eup %4132 }
 0x8d9   : > { %2098 = vadd.xlane.f32.xlu0 %v5432_v53 }
 0x8dc   : > { %v5435_v11 = vpop.eup %4134 }
 0x8dd   : > { %2094 = vadd.xlane.f32.xlu0 %v5435_v11  ;;  %v5438_v39 = vpop.eup %4136 }
 0x8de   : > { %v5440_v45 = vpop.eup %4138 }
 0x8e1   : > { %2100 = vadd.xlane.f32.xlu0 %v5438_v39  ;;  %2096 = vadd.xlane.f32.xlu1 %v5440_v45 }
 0x8f2   : > { %2295 = vrot.lane.b32.xlu1 %v5096_v36, %s4541_s20 }
 0x8f6   : > { %2275 = vrot.lane.b32.xlu1 %v5073_v7, %s4541_s20 }
 0x8f7   : > { %2289 = vrot.lane.b32.xlu0 %v5080_v14, %s4541_s20 }
 0x8fa   : > { %2279 = vrot.lane.b32.xlu1 %v5091_v33, %s4541_s20 }
 0x8fb   : > { %2273 = vrot.lane.b32.xlu0 %v5076_v9, %s4541_s20 }
 0x8ff   : > { %2277 = vrot.lane.b32.xlu0 %v5094_v35, %s4541_s20 }
 0x929   : > { %v2091_v40 = vpop.xlane.xlu1 %2090 }
 0x92c   : > { %v2089_v2 = vpop.xlane.xlu0 %2088 }
 0x92d   : > { %4140 = vrcp.f32 %v2089_v2  ;;  %v2087_v36 = vpop.xlane.xlu1 %2086 }
 0x92e   : > { %4142 = vrcp.f32 %v2087_v36 }
 0x92f   : > { %4144 = vrcp.f32 %v2091_v40 }
 0x930   : > { %v2286_v59 = vpop.permute.xlu0 %2285 }
 0x931   : > { %v2093_v7 = vpop.xlane.xlu1 %2092  ;;  %v2316_v61 = vsel %vm1262_vm0, %v2286_v59, 0 }
 0x932   : > { %4146 = vrcp.f32 %v2093_v7 }
 0x935   : > { %v2288_v1 = vpop.permute.xlu1 %2287 }
 0x936   : > { %v2319_v38 = vsel %vm1262_vm0, %v2288_v1, 0 }
 0x937   : > { %v4141_v14 = vpop.eup %4140 }
 0x938   : > { %v4143_v3 = vpop.eup %4142  ;;  %v2111_v33 = vmul.f32 %v4141_v14, %v4127_v13 }
 0x939   : > { %v2110_v4 = vmul.f32 %v4143_v3, %v4129_v15  ;;  %v4145_v51 = vpop.eup %4144  ;;  %v2292_v60 = vpop.permute.xlu1 %2291 }
 0x93a   : > { %v2112_v54 = vmul.f32 %v4145_v51, %v4125_v37  ;;  %v2325_v21 = vsel %vm1262_vm0, %v2292_v60, 0 }
 0x93b   : > { %v2118_v9 = vpack.c.bf16 %v2111_v33, %v2110_v4 }
 0x93c   : > { %v4147_v52 = vpop.eup %4146 }
 0x93d   : > { %v2113_v35 = vmul.f32 %v4147_v52, %v4131_v16  ;;  %3334 = vst [vmem:[%s5269_s6 + $0x40] sm:$0xff] %v2118_v9   ;;  %3718 = vmatprep.mubr.bf16.mxu0 %v2118_v9  ;;  %v2294_v12 = vpop.permute.xlu1 %2293 }
 0x93f   : > { %v2119_v55 = vpack.c.bf16 %v2113_v35, %v2112_v54 }
 0x941   : > { %3335 = vst [vmem:[%s5269_s6 + $0x48] sm:$0xff] %v2119_v55   ;;  %3719 = vmatmul.mubr.bf16.vlgmr.msra.gmra.mrb[40].mxu0 %v2119_v55 }
 0x942   : > { %3727 = vmatpush3.bf16.xpose.msra.mxu0 %v2310_v56 }
 0x943   : > { %3823 = vmatprep.subr.msk.bf16.mxu0 %vm1262_vm0, %v2284_v46 }
 0x94a   : > { %3729 = vmatpush3.bf16.xpose.msra.mxu0 %v2313_v58 }
 0x94b   : > { %3824 = vmatprep.subr.msk.bf16.mxu0 %vm1262_vm0, %v2286_v59 }
 0x952   : > { %3731 = vmatpush3.bf16.xpose.msra.mxu0 %v2316_v61 }
 0x953   : > { %3825 = vmatprep.subr.msk.bf16.mxu0 %vm1262_vm0, %v2288_v1 }
 0x95a   : > { %3733 = vmatpush3.bf16.xpose.msra.mxu0 %v2319_v38 }
 0x966   : > { %v2099_v0 = vpop.xlane.xlu0 %2098 }
 0x967   : > { %4148 = vrcp.f32 %v2099_v0 }
 0x96a   : > { %v2095_v37 = vpop.xlane.xlu0 %2094 }
 0x96b   : > { %4150 = vrcp.f32 %v2095_v37 }
 0x96e   : > { %v2101_v13 = vpop.xlane.xlu0 %2100  ;;  %v2097_v15 = vpop.xlane.xlu1 %2096 }
 0x96f   : > { %4152 = vrcp.f32 %v2101_v13 }
 0x970   : > { %4154 = vrcp.f32 %v2097_v15 }
 0x971   : > { %v4149_v8 = vpop.eup %4148 }
 0x972   : > { %v2290_v16 = vpop.permute.xlu0 %2289  ;;  %v2116_v6 = vmul.f32 %v4149_v8, %v5432_v53  ;;  %v2328_v53 = vsel %vm1262_vm0, %v2294_v12, 0 }
 0x973   : > { %v2322_v17 = vsel %vm1262_vm0, %v2290_v16, 0  ;;  %3826 = vmatprep.subr.msk.bf16.mxu0 %vm1262_vm0, %v2290_v16 }
 0x974   : > { %3735 = vmatpush3.bf16.xpose.msra.mxu0 %v2322_v17 }
 0x975   : > { %3827 = vmatprep.subr.msk.bf16.mxu0 %vm1262_vm0, %v2292_v60  ;;  %v4151_v10 = vpop.eup %4150 }
 0x976   : > { %v2114_v42 = vmul.f32 %v4151_v10, %v5435_v11  ;;  %v2274_v46 = vpop.permute.xlu0 %2273 }
 0x979   : > { %v4153_v49 = vpop.eup %4152 }
 0x97a   : > { %v4155_v57 = vpop.eup %4154  ;;  %v2117_v20 = vmul.f32 %v4153_v49, %v5438_v39  ;;  %v2296_v39 = vpop.permute.xlu1 %2295 }
 0x97b   : > { %v2115_v50 = vmul.f32 %v4155_v57, %v5440_v45  ;;  %v2331_v11 = vsel %vm1262_vm0, %v2296_v39, 0  ;;  %v2278_v40 = vpop.permute.xlu0 %2277 }
 0x97c   : > { %3737 = vmatpush3.bf16.xpose.msra.mxu0 %v2325_v21  ;;  %v2121_v43 = vpack.c.bf16 %v2117_v20, %v2116_v6 }
 0x97d   : > { %3828 = vmatprep.subr.msk.bf16.mxu0 %vm1262_vm0, %v2294_v12  ;;  %v2120_v44 = vpack.c.bf16 %v2115_v50, %v2114_v42 }
 0x97e   : > { %3337 = vst [vmem:[%s5269_s6 + $0x58] sm:$0xff] %v2121_v43   ;;  %v2276_v45 = vpop.permute.xlu1 %2275 }
 0x97f   : > { %3336 = vst [vmem:[%s5269_s6 + $0x50] sm:$0xff] %v2120_v44   ;;  %3722 = vmatprep.mubr.bf16.mxu0 %v2120_v44 }
 0x980   : > { %3723 = vmatmul.mubr.bf16.gmra.mrb[44].mxu0 %v2121_v43 }
 0x981   : > { %3742 = vmatprep.mubr.msk.bf16.mxu0 %vm1262_vm0, %v2274_v46 }
 0x982   : > { %v2280_v2 = vpop.permute.xlu1 %2279 }
 0x984   : > { %3739 = vmatpush3.bf16.xpose.msra.mxu0 %v2328_v53 }
 0x985   : > { %3829 = vmatprep.subr.msk.bf16.mxu0 %vm1262_vm0, %v2296_v39 }
 0x98c   : > { %3741 = vmatpush3.bf16.xpose.msra.mxu0 %v2331_v11 }
 0x993   : > { %3743 = vmatmul.mubr.msk.bf16.vlgmr.msra.gmra.mrb[48].mxu0 %vm1262_vm0, %v2276_v45 }
 0x994   : > { %3746 = vmatprep.mubr.msk.bf16.mxu0 %vm1262_vm0, %v2278_v40 }
 0x99b   : > { %3747 = vmatmul.mubr.msk.bf16.gmra.mrb[52].mxu0 %vm1262_vm0, %v2280_v2 }
 0xa14   : > { %v5484_v36 = vpop.f32.mrb[40].mxu0 }
 0xa15   : > { %v5486_v7 = vpop.f32.mrb[41].mxu0 }
 0xa16   : > { %v5488_v14 = vpop.f32.mrb[42].mxu0 }
 0xa17   : > { %v2249_v3 = vpack.c.bf16 %v5488_v14, %v5484_v36  ;;  %v5492_v33 = vpop.f32.mrb[43].mxu0 }
 0xa18   : > { %v2248_v4 = vpack.c.bf16 %v5492_v33, %v5486_v7 }
 0xa53   : > { %v5496_v51 = vpop.f32.mrb[44].mxu0 }
 0xa54   : > { %v5498_v9 = vpop.f32.mrb[45].mxu0 }
 0xa55   : > { %v5500_v52 = vpop.f32.mrb[46].mxu0 }
 0xa56   : > { %v2251_v54 = vpack.c.bf16 %v5500_v52, %v5496_v51  ;;  %v5504_v35 = vpop.f32.mrb[47].mxu0 }
 0xa57   : > { %v2250_v55 = vpack.c.bf16 %v5504_v35, %v5498_v9 }
 0xa66   : > { %v3744_v56 = vpop.f32.mrb[48].mxu0 }
 0xa67   : > { %2402 = vmax.xlane.f32.xlu0 %v3744_v56  ;;  %v2367_v58 = vpop.f32.mrb[49].mxu0 }
 0xa68   : > { %v3745_v59 = vpop.f32.mrb[50].mxu0 }
 0xa69   : > { %v2370_v61 = vpop.f32.mrb[51].mxu0 }
 0xa6a   : > { %2400 = vmax.xlane.f32.xlu1 %v2370_v61 }
 0xa6b   : > { %2398 = vmax.xlane.f32.xlu0 %v2367_v58 }
 0xa6e   : > { %v3748_v1 = vpop.f32.mrb[52].mxu0 }
 0xa6f   : > { %2404 = vmax.xlane.f32.xlu0 %v3745_v59  ;;  %v2383_v38 = vpop.f32.mrb[53].mxu0 }
 0xa70   : > { %v5508_v60 = vpop.f32.mrb[54].mxu0 }
 0xa71   : > { %v5510_v0 = vpop.f32.mrb[55].mxu0 }
 0xa73   : > { %2406 = vmax.xlane.f32.xlu0 %v2383_v38 }
 0xa77   : > { %2410 = vmax.xlane.f32.xlu0 %v3748_v1 }
 0xa7b   : > { %2513 = vrot.lane.b32.xlu1 %v5159_v26, %s4541_s20 }
 0xa7f   : > { %2519 = vrot.lane.b32.xlu1 %v5193_v63, %s4541_s20 }
 0xa8d   : > { %2511 = vrot.lane.b32.xlu0 %v5161_v30, %s4541_s20 }
 0xa91   : > { %2515 = vrot.lane.b32.xlu0 %v5173_v48, %s4541_s20 }
 0xa95   : > { %2517 = vrot.lane.b32.xlu0 %v5170_v47, %s4541_s20 }
 0xaa3   : > { %2412 = vmax.xlane.f32.xlu1 %v5508_v60 }
 0xaa7   : > { %2408 = vmax.xlane.f32.xlu1 %v5510_v0 }
 0xab8   : > { %2521 = vrot.lane.b32.xlu1 %v5191_v62, %s4541_s20 }
 0xaf4   : > { %v2403_v26 = vpop.xlane.xlu0 %2402 }
 0xaf5   : > { %v2416_v12 = vsub.f32 %v3744_v56, %v2403_v26 }
 0xaf7   : > { %v2426_v37 = vmul.f32 1.442695, %v2416_v12  ;;  %v2401_v30 = vpop.xlane.xlu1 %2400 }
 0xaf8   : > { %v2399_v63 = vpop.xlane.xlu0 %2398  ;;  %v2415_v48 = vsub.f32 %v2370_v61, %v2401_v30 }
 0xaf9   : > { %4156 = vpow2.f32 %v2426_v37  ;;  %v2414_v13 = vsub.f32 %v2367_v58, %v2399_v63 }
 0xafa   : > { %v2424_v10 = vmul.f32 1.442695, %v2415_v48 }
 0xafb   : > { %v2422_v15 = vmul.f32 1.442695, %v2414_v13  ;;  %v2514_v43 = vpop.permute.xlu1 %2513 }
 0xafc   : > { %v2405_v16 = vpop.xlane.xlu0 %2404 }
 0xafd   : > { %4158 = vpow2.f32 %v2422_v15  ;;  %v2417_v17 = vsub.f32 %v3745_v59, %v2405_v16 }
 0xaff   : > { %v2428_v47 = vmul.f32 1.442695, %v2417_v17  ;;  %v2520_v45 = vpop.permute.xlu1 %2519 }
 0xb00   : > { %v2407_v8 = vpop.xlane.xlu0 %2406 }
 0xb01   : > { %4160 = vpow2.f32 %v2428_v47  ;;  %v2418_v62 = vsub.f32 %v2383_v38, %v2407_v8 }
 0xb02   : > { %4162 = vpow2.f32 %v2424_v10 }
 0xb03   : > { %v5526_v49 = vpop.eup %4156  ;;  %v2430_v50 = vmul.f32 1.442695, %v2418_v62 }
 0xb04   : > { %v2411_v57 = vpop.xlane.xlu0 %2410  ;;  %2442 = vadd.xlane.f32.xlu1 %v5526_v49 }
 0xb05   : > { %v2420_v6 = vsub.f32 %v3748_v1, %v2411_v57 }
 0xb07   : > { %v5529_v20 = vpop.eup %4158  ;;  %v2434_v21 = vmul.f32 1.442695, %v2420_v6  ;;  %v4052_v6 = vld [vmem:[#allocation14] sm:$0xff]  }
 0xb08   : > { %v2512_v42 = vpop.permute.xlu0 %2511  ;;  %2438 = vadd.xlane.f32.xlu1 %v5529_v20 }
 0xb09   : > { %4164 = vpow2.f32 %v2434_v21  ;;  %3750 = vmatprep.subr.bf16.mxu1 %v2512_v42  ;;  %v4054_v21 = vld [vmem:[#allocation14 + $0x10] sm:$0xff]  }
 0xb0a   : > { %3751 = vmatpush3.bf16.msra.mxu1 %v2512_v42  ;;  %4166 = vpow2.f32 %v2430_v50  ;;  %v4055_v42 = vld [vmem:[#allocation14 + $0x18] sm:$0xff]   ;;  %v4056_v50 = vld [vmem:[#allocation14 + $0x20] sm:$0xff]  }
 0xb0b   : > { %v4161_v44 = vpop.eup %4160  ;;  %3752 = vmatprep.subr.bf16.mxu1 %v2514_v43 }
 0xb0c   : > { %v2516_v46 = vpop.permute.xlu0 %2515  ;;  %2444 = vadd.xlane.f32.xlu1 %v4161_v44  ;;  %v4163_v53 = vpop.eup %4162 }
 0xb0e   : > { %3753 = vmatpush3.bf16.msra.mxu1 %v2514_v43  ;;  %v4057_v43 = vld [vmem:[#allocation14 + $0x28] sm:$0xff]  }
 0xb0f   : > { %3754 = vmatprep.subr.bf16.mxu1 %v2516_v46 }
 0xb10   : > { %2440 = vadd.xlane.f32.xlu1 %v4163_v53  ;;  %v2518_v39 = vpop.permute.xlu0 %2517 }
 0xb12   : > { %3755 = vmatpush3.bf16.msra.mxu1 %v2516_v46  ;;  %v4059_v46 = vld [vmem:[#allocation14 + $0x38] sm:$0xff]  }
 0xb13   : > { %v5532_v11 = vpop.eup %4164  ;;  %3756 = vmatprep.subr.bf16.mxu1 %v2518_v39 }
 0xb14   : > { %2450 = vadd.xlane.f32.xlu0 %v5532_v11  ;;  %v5535_v40 = vpop.eup %4166 }
 0xb16   : > { %3757 = vmatpush3.bf16.msra.mxu1 %v2518_v39 }
 0xb17   : > { %3758 = vmatprep.subr.bf16.mxu1 %v2520_v45 }
 0xb18   : > { %2446 = vadd.xlane.f32.xlu0 %v5535_v40 }
 0xb1a   : > { %3759 = vmatpush3.bf16.msra.mxu1 %v2520_v45 }
 0xb30   : > { %v2413_v2 = vpop.xlane.xlu1 %2412 }
 0xb31   : > { %v2421_v56 = vsub.f32 %v5508_v60, %v2413_v2 }
 0xb33   : > { %v2436_v58 = vmul.f32 1.442695, %v2421_v56 }
 0xb34   : > { %v2409_v59 = vpop.xlane.xlu1 %2408 }
 0xb35   : > { %4168 = vpow2.f32 %v2436_v58  ;;  %v2419_v61 = vsub.f32 %v5510_v0, %v2409_v59 }
 0xb37   : > { %v2432_v1 = vmul.f32 1.442695, %v2419_v61 }
 0xb38   : > { %v2522_v38 = vpop.permute.xlu1 %2521 }
 0xb39   : > { %4170 = vpow2.f32 %v2432_v1  ;;  %3760 = vmatprep.subr.bf16.mxu1 %v2522_v38 }
 0xb3a   : > { %3761 = vmatpush3.bf16.msra.mxu1 %v2522_v38 }
 0xb3f   : > { %v4169_v26 = vpop.eup %4168 }
 0xb40   : > { %2452 = vadd.xlane.f32.xlu0 %v4169_v26 }
 0xb43   : > { %v5540_v12 = vpop.eup %4170 }
 0xb44   : > { %2448 = vadd.xlane.f32.xlu1 %v5540_v12 }
 0xb55   : > { %2525 = vrot.lane.b32.xlu1 %v5206_v18, %s4541_s20 }
 0xb56   : > { %2523 = vrot.lane.b32.xlu0 %v5208_v19, %s4541_s20 }
 0xb59   : > { %1906 = vrot.lane.b32.xlu1 %v1897_v25, %s4541_s20 }
 0xb5a   : > { %1904 = vrot.lane.b32.xlu0 %v1896_v28, %s4541_s20 }
 0xb5d   : > { %2258 = vrot.lane.b32.xlu1 %v2249_v3, %s4540_s27 }
 0xb5e   : > { %2256 = vrot.lane.b32.xlu0 %v2248_v4, %s4540_s27 }
 0xb61   : > { %1910 = vrot.lane.b32.xlu1 %v1899_v5, %s4541_s20 }
 0xb62   : > { %1908 = vrot.lane.b32.xlu0 %v1898_v29, %s4541_s20  ;;  %s4390_s20 = scalar_lea.vmem %s5608_s5, 1024 }
 0xb63   : > { %p4391_p13 = scmp.ne.s32.totalorder %s5608_s5, %s4390_s20  ;;  %p4398_p9 = scmp.lt.s32.totalorder %s4396_s18, %s4390_s20 }
 0xb65   : > { %p4392_p1 = pnand %p4391_p13, %p5812_p4  ;;  %p4399_p7 = por %p4398_p9, %p4397_p8 }
 0xb67   : > { %p4393_p0 = pneg %p4392_p1 }
 0xb69   : > { %p4400_p2 = pnand %p4399_p7, %p4393_p0 }
 0xb91   : > { %v2443_v18 = vpop.xlane.xlu1 %2442 }
 0xb92   : > { %4172 = vrcp.f32 %v2443_v18 }
 0xb95   : > { %v2439_v19 = vpop.xlane.xlu1 %2438 }
 0xb99   : > { %v2445_v22 = vpop.xlane.xlu1 %2444 }
 0xb9a   : > { %4174 = vrcp.f32 %v2445_v22  ;;  %v3194_v22 = vld [vmem:[%s5810_s14] ss:$0 sm:$0xff] }
 0xb9b   : > { %4176 = vrcp.f32 %v2439_v19 }
 0xb9c   : > { %v4173_v24 = vpop.eup %4172 }
 0xb9d   : > { %v2441_v23 = vpop.xlane.xlu1 %2440  ;;  %v2464_v27 = vmul.f32 %v4173_v24, %v5526_v49 }
 0xb9e   : > { %4178 = vrcp.f32 %v2441_v23 }
 0xba1   : > { %v2451_v36 = vpop.xlane.xlu0 %2450 }
 0xba2   : > { %4180 = vrcp.f32 %v2451_v36 }
 0xba4   : > { %v4175_v25 = vpop.eup %4174 }
 0xba5   : > { %v2465_v28 = vmul.f32 %v4175_v25, %v4161_v44  ;;  %v4177_v31 = vpop.eup %4176  ;;  %v2447_v7 = vpop.xlane.xlu0 %2446  ;;  %v4058_v44 = vld [vmem:[#allocation14 + $0x30] sm:$0xff]  }
 0xba6   : > { %v2462_v32 = vmul.f32 %v4177_v31, %v5529_v20  ;;  %v4053_v20 = vld [vmem:[#allocation14 + $0x8] sm:$0xff]  }
 0xba7   : > { %v2471_v34 = vpack.c.bf16 %v2465_v28, %v2464_v27 }
 0xba8   : > { %v4179_v5 = vpop.eup %4178 }
 0xba9   : > { %v2463_v41 = vmul.f32 %v4179_v5, %v4163_v53  ;;  %3339 = vst [vmem:[%s5269_s6 + $0x68] sm:$0xff] %v2471_v34  }
 0xbab   : > { %v2470_v29 = vpack.c.bf16 %v2463_v41, %v2462_v32 }
 0xbac   : > { %v4181_v0 = vpop.eup %4180 }
 0xbad   : > { %3338 = vst [vmem:[%s5269_s6 + $0x60] sm:$0xff] %v2470_v29   ;;  %3766 = vmatprep.mubr.bf16.mxu1 %v2470_v29  ;;  %v2468_v30 = vmul.f32 %v4181_v0, %v5532_v11 }
 0xbcd   : > { %v2453_v14 = vpop.xlane.xlu0 %2452 }
 0xbce   : > { %4182 = vrcp.f32 %v2453_v14 }
 0xbcf   : > { %4184 = vrcp.f32 %v2447_v7 }
 0xbd1   : > { %v2524_v3 = vpop.permute.xlu0 %2523  ;;  %v2449_v33 = vpop.xlane.xlu1 %2448 }
 0xbd2   : > { %4186 = vrcp.f32 %v2449_v33  ;;  %3762 = vmatprep.subr.bf16.mxu1 %v2524_v3 }
 0xbd3   : > { %3763 = vmatpush3.bf16.msra.mxu1 %v2524_v3 }
 0xbd5   : > { %v1905_v4 = vpop.permute.xlu0 %1904  ;;  %v2526_v60 = vpop.permute.xlu1 %2525 }
 0xbd6   : > { %1917 = vst.msk [vmem:[#allocation2] sm:$0xff] %vm1916_vm1, %v1905_v4  ;;  %3764 = vmatprep.subr.bf16.mxu1 %v2526_v60 }
 0xbd7   : > { %3765 = vmatpush3.bf16.msra.mxu1 %v2526_v60 }
 0xbd8   : > { %v4183_v37 = vpop.eup %4182  ;;  %3774 = vmatprep.subr.bf16.mxu1 %v4052_v6 }
 0xbd9   : > { %v2257_v63 = vpop.permute.xlu0 %2256  ;;  %v1907_v13 = vpop.permute.xlu1 %1906  ;;  %v2469_v15 = vmul.f32 %v4183_v37, %v4169_v26 }
 0xbda   : > { %v4185_v16 = vpop.eup %4184  ;;  %2269 = vst.msk [vmem:[#allocation2] sm:$0xff] %vm2268_vm2, %v2257_v63  ;;  %3767 = vmatmul.mubr.bf16.vlgmr.msra.gmra.mrb[40].mxu1 %v2471_v34 }
 0xbdb   : > { %1918 = vst.msk [vmem:[#allocation2 + $0x8] sm:$0xff] %vm1916_vm1, %v1907_v13  ;;  %v2473_v48 = vpack.c.bf16 %v2469_v15, %v2468_v30  ;;  %v2466_v10 = vmul.f32 %v4185_v16, %v5535_v40  ;;  %3775 = vmatpush3.bf16.msra.mxu1 %v4052_v6 }
 0xbdc   : > { %v4187_v17 = vpop.eup %4186  ;;  %3776 = vmatprep.subr.bf16.mxu1 %v4053_v20 }
 0xbdd   : > { %v1909_v47 = vpop.permute.xlu0 %1908  ;;  %v2259_v8 = vpop.permute.xlu1 %2258  ;;  %v2467_v49 = vmul.f32 %v4187_v17, %v5540_v12  ;;  %3341 = vst [vmem:[%s5269_s6 + $0x78] sm:$0xff] %v2473_v48  }
 0xbde   : > { %1919 = vst.msk [vmem:[#allocation2 + $0x10] sm:$0xff] %vm1916_vm1, %v1909_v47 }
 0xbdf   : > { %2270 = vst.msk [vmem:[#allocation2 + $0x8] sm:$0xff] %vm2268_vm2, %v2259_v8  ;;  %v2472_v57 = vpack.c.bf16 %v2467_v49, %v2466_v10  ;;  %3777 = vmatpush3.bf16.msra.mxu1 %v4053_v20 }
 0xbe0   : > { %3778 = vmatprep.subr.bf16.mxu1 %v4054_v21 }
 0xbe1   : > { %3340 = vst [vmem:[%s5269_s6 + $0x70] sm:$0xff] %v2472_v57   ;;  %3770 = vmatprep.mubr.bf16.mxu1 %v2472_v57  ;;  %v1911_v62 = vpop.permute.xlu1 %1910 }
 0xbe2   : > { %1920 = vst.msk [vmem:[#allocation2 + $0x18] sm:$0xff] %vm1916_vm1, %v1911_v62  ;;  %3771 = vmatmul.mubr.bf16.gmra.mrb[44].mxu1 %v2473_v48 }
 0xbe3   : > { %3779 = vmatpush3.bf16.msra.mxu1 %v4054_v21 }
 0xbe4   : > { %3780 = vmatprep.subr.bf16.mxu1 %v4055_v42 }
 0xbe7   : > { %3781 = vmatpush3.bf16.msra.mxu1 %v4055_v42 }
 0xbe8   : > { %3782 = vmatprep.subr.bf16.mxu1 %v4056_v50 }
 0xbeb   : > { %3783 = vmatpush3.bf16.msra.mxu1 %v4056_v50 }
 0xbec   : > { %3784 = vmatprep.subr.bf16.mxu1 %v4057_v43 }
 0xbef   : > { %3785 = vmatpush3.bf16.msra.mxu1 %v4057_v43 }
 0xbf0   : > { %3786 = vmatprep.subr.bf16.mxu1 %v4058_v44 }
 0xbf3   : > { %3787 = vmatpush3.bf16.msra.mxu1 %v4058_v44 }
 0xbf4   : > { %3788 = vmatprep.subr.bf16.mxu1 %v4059_v46 }
 0xbf7   : > { %3789 = vmatpush3.bf16.msra.mxu1 %v4059_v46 }
 0xcad   : > { %v3768_v53 = vpop.f32.mrb[40].mxu1 }
 0xcae   : > { %v2569_v39 = vpop.f32.mrb[41].mxu1 }
 0xcaf   : > { %v3769_v11 = vpop.f32.mrb[42].mxu1 }
 0xcb0   : > { %v2601_v45 = vpack.c.bf16 %v3769_v11, %v3768_v53  ;;  %v2572_v40 = vpop.f32.mrb[43].mxu1 }
 0xcb1   : > { %v2600_v2 = vpack.c.bf16 %v2572_v40, %v2569_v39 }
 0xcb2   : > { %2610 = vrot.lane.b32.xlu1 %v2601_v45, %s4539_s1 }
 0xcb3   : > { %2608 = vrot.lane.b32.xlu0 %v2600_v2, %s4539_s1 }
 0xcb5   : > { %v3772_v56 = vpop.f32.mrb[44].mxu1 }
 0xcb6   : > { %2262 = vrot.lane.b32.xlu1 %v2251_v54, %s4540_s27  ;;  %v2585_v58 = vpop.f32.mrb[45].mxu1 }
 0xcb7   : > { %2260 = vrot.lane.b32.xlu0 %v2250_v55, %s4540_s27  ;;  %v3773_v59 = vpop.f32.mrb[46].mxu1  ;;  %s2774_s27 = scalar_lea.sflag [#allocation5], %s4996_s24 }
 0xcb8   : > { %v2603_v61 = vpack.c.bf16 %v3773_v59, %v3772_v56  ;;  %v2588_v1 = vpop.f32.mrb[47].mxu1 }
 0xcb9   : > { %v2602_v38 = vpack.c.bf16 %v2588_v1, %v2585_v58 }
 0xcba   : > { %2614 = vrot.lane.b32.xlu1 %v2603_v61, %s4539_s1 }
 0xcbb   : > { %2612 = vrot.lane.b32.xlu0 %v2602_v38, %s4539_s1  ;;  %s3207_s1 = sshll.u32 %s2791_s0, 7 }
 0xcbc   : > { %s5613_s8 = scalar_lea.hbm %s5811_s3, %s3207_s1 }
 0xd24   : > { %v2611_v26 = vpop.permute.xlu1 %2610 }
 0xd25   : > { %2622 = vst.msk [vmem:[#allocation2 + $0x8] sm:$0xff] %vm2620_vm3, %v2611_v26  ;;  %v2609_v12 = vpop.permute.xlu0 %2608 }
 0xd26   : > { %2621 = vst.msk [vmem:[#allocation2] sm:$0xff] %vm2620_vm3, %v2609_v12 }
 0xd28   : > { %v2263_v51 = vpop.permute.xlu1 %2262 }
 0xd29   : > { %2272 = vst.msk [vmem:[#allocation2 + $0x18] sm:$0xff] %vm2268_vm2, %v2263_v51  ;;  %v2261_v52 = vpop.permute.xlu0 %2260 }
 0xd2a   : > { %2271 = vst.msk [vmem:[#allocation2 + $0x10] sm:$0xff] %vm2268_vm2, %v2261_v52 }
 0xd2c   : > { %v2615_v9 = vpop.permute.xlu1 %2614  ;;  %v2626_v55 = vld [vmem:[#allocation2 + $0x8] sm:$0xff] }
 0xd2d   : > { %2624 = vst.msk [vmem:[#allocation2 + $0x18] sm:$0xff] %vm2620_vm3, %v2615_v9  ;;  %v2613_v54 = vpop.permute.xlu0 %2612  ;;  %v2625_v35 = vld [vmem:[#allocation2] sm:$0xff] }
 0xd2e   : > { %2623 = vst.msk [vmem:[#allocation2 + $0x10] sm:$0xff] %vm2620_vm3, %v2613_v54  ;;  %3790 = vmatprep.mubr.bf16.mxu1 %v2625_v35 }
 0xd2f   : > { %3791 = vmatmul.mubr.bf16.vlgmr.msra.gmra.mrb[48].mxu1 %v2626_v55 }
 0xd34   : > { %v2628_v19 = vld [vmem:[#allocation2 + $0x18] sm:$0xff] }
 0xd35   : > { %v2627_v18 = vld [vmem:[#allocation2 + $0x10] sm:$0xff] }
 0xd36   : > { %3794 = vmatprep.mubr.bf16.mxu1 %v2627_v18 }
 0xd37   : > { %3795 = vmatmul.mubr.bf16.gmra.mrb[52].mxu1 %v2628_v19 }
 0xe02   : > { %v3792_v23 = vpop.f32.mrb[48].mxu1 }
 0xe03   : > { %v2743_v24 = vadd.f32 %v3792_v23, %v3194_v22  ;;  %v2734_v25 = vpop.f32.mrb[49].mxu1 }
 0xe04   : > { %v2735_v27 = vadd.f32 %v3194_v22, %v2734_v25  ;;  %v3793_v28 = vpop.f32.mrb[50].mxu1 }
 0xe05   : > { %2767 = vst [vmem:[%s590_s4 + $0x10] sm:$0xff] %v2743_v24  ;;  %v2746_v31 = vadd.f32 %v3793_v28, %v3194_v22  ;;  %v2737_v34 = vpop.f32.mrb[51].mxu1 }
 0xe06   : > { %2765 = vst [vmem:[%s590_s4] sm:$0xff] %v2735_v27  ;;  %v2738_v5 = vadd.f32 %v3194_v22, %v2737_v34 }
 0xe07   : > { %2768 = vst [vmem:[%s590_s4 + $0x18] sm:$0xff] %v2746_v31 }
 0xe08   : > { %2766 = vst [vmem:[%s590_s4 + $0x8] sm:$0xff] %v2738_v5 }
 0xe0a   : > { %v3796_v32 = vpop.f32.mrb[52].mxu1 }
 0xe0b   : > { %v2759_v41 = vadd.f32 %v3796_v32, %v3194_v22  ;;  %v2750_v29 = vpop.f32.mrb[53].mxu1 }
 0xe0c   : > { %v2751_v36 = vadd.f32 %v3194_v22, %v2750_v29  ;;  %v3797_v7 = vpop.f32.mrb[54].mxu1 }
 0xe0d   : > { %2771 = vst [vmem:[%s590_s4 + $0x30] sm:$0xff] %v2759_v41  ;;  %v2762_v14 = vadd.f32 %v3797_v7, %v3194_v22  ;;  %v2753_v3 = vpop.f32.mrb[55].mxu1 }
 0xe0e   : > { %2769 = vst [vmem:[%s590_s4 + $0x20] sm:$0xff] %v2751_v36  ;;  %v2754_v33 = vadd.f32 %v3194_v22, %v2753_v3 }
 0xe0f   : > { %2772 = vst [vmem:[%s590_s4 + $0x38] sm:$0xff] %v2762_v14 }
 0xe10   : > { %2770 = vst [vmem:[%s590_s4 + $0x28] sm:$0xff] %v2754_v33 }
 0xe11   : > { %4403 = shalt.err (!%p4400_p2)
}
 0xe12   : > { %s4404_s14 = scalar_lea.hbm %s5613_s8, 1024  ;;  %s4408_s0 = scalar_lea.hbm %s5811_s3, 4096 }
 0xe13   : > { %p4405_p10 = scmp.ne.s32.totalorder %s5613_s8, %s4404_s14  ;;  %p4409_p6 = scmp.lt.u32.totalorder %s5613_s8, %s5811_s3 }
 0xe14   : > { %p4410_p12 = scmp.lt.u32.totalorder %s4408_s0, %s4404_s14  ;;  %p4412_p13 = scmp.lt.u32.totalorder %s4404_s14, %s5613_s8 }
 0xe15   : > { %p4406_p3 = pnand %p4405_p10, %p5812_p4 }
 0xe16   : > { %p4411_p11 = por %p4410_p12, %p4409_p6 }
 0xe17   : > { %p4407_p5 = pneg %p4406_p3 }
 0xe18   : > { %p4413_p1 = por %p4412_p13, %p4411_p11 }
 0xe1a   : > { %p4414_p0 = pnand %p4413_p1, %p4407_p5 }
 0xe1c   : > { %4417 = shalt.err (!%p4414_p0)
}
 0xe1d   : > { %s4543_s23 = smov 128   ;;  %s4544_s20 = smov 8  }
 0xe1e   : > { %3852 = dma.vmem_to_hbm [thread:$0]  (%p5812_p4), %s5608_s5, 1024, %s5613_s8, %s2774_s27, %s4543_s23, %s4543_s23, %s4544_s20  }
 0xe1f   : > { %s2779_s9 = scalar_lea.sflag [#allocation17], %s4996_s24 }
 0xe20   : > { %s3209_s19 = sshll.u32 %s5809_s12, 6  ;;  %s2828_s18 = sshll.u32 %s5269_s6, 4  ;;  %s2829_s18 = int_to_ptr.vmem [resolvable:$true] %s2828_s18 }
 0xe21   : > { %s2809_s14 = sadd.s32 %s3209_s19, %s3205_s11  ;;  %s5813_s5 = sld [smem:[#allocation47_spill]] }
 0xe22   : > { %s3210_s4 = sshll.u32 %s2809_s14, 6  ;;  %s4545_s8 = smov 512  }
 0xe23   : > { %3853 = sst [smem:[#allocation19]] (%p5812_p4), %s4545_s8  ;;  %s4546_s27 = smov 1024  }
 0xe24   : > { %3854 = sst [smem:[#allocation19 + $0x1]] (%p5812_p4), %s4546_s27  ;;  %s4547_s1 = smov 8  }
 0xe25   : > { %3855 = sst [smem:[#allocation19 + $0x2]] (%p5812_p4), %s4547_s1  ;;  %s4548_s12 = smov 64  }
 0xe26   : > { %3856 = sst [smem:[#allocation19 + $0x3]] (%p5812_p4), %s4548_s12  ;;  %s4549_s6 = smov 4  }
 0xe27   : > { %s2811_s24 = scalar_lea.hbm %s5813_s5, %s3210_s4  ;;  %3857 = sst [smem:[#allocation19 + $0x4]] (%p5812_p4), %s4548_s12 }
 0xe28   : > { %3858 = sst [smem:[#allocation19 + $0x5]] (%p5812_p4), %s4549_s6  ;;  %s4550_s15 = smov [#allocation18]  }
 0xe29   : > { %s4551_s11 = smov 0  }
 0xe2a   : > { %3859 = dma.general (%p5812_p4), %s2829_s18, 2048, %s2811_s24, %s2779_s9, %s4550_s15, [#allocation19], %s4551_s11, 0  }
 0xe2b PF: > { %s5814_s21 = sld [smem:[#allocation28_spill]]  ;;  %s5815_s23 = sld [smem:[#allocation35_spill]] }
 0xe2c   : > { %p3901_p8 = scmp.ge.s32.totalorder %s4528_s13, 2 }
 0xe31   : > { %s2856_s20 = sand.u32 1, %s5814_s21   ;;  %p5816_p9 = scmp.ne.s32.totalorder %s5815_s23, 0 }
 0xe32   : > { %s2857_s19 = scalar_lea.sflag [#allocation5], %s2856_s20 }
 0xe33   : > { %p3886_p7 = pnand %p3901_p8, %p5816_p9 }
 0xe35   : > { %4479 = dma.done.wait (!%p3886_p7), %s2857_s19, 1024  }
 0xe36   : > { %4481 = vsyncadd (!%p3886_p7), %s2857_s19, 4294966272  ;;  %s2866_s14 = scalar_lea.sflag [#allocation17], %s2856_s20 }
 0xe37   : > { %4483 = dma.done.wait (!%p3886_p7), %s2866_s14, 2048  }
 0xe38   : > { %4485 = vsyncadd (!%p3886_p7), %s2866_s14, 4294965248  ;;  %s37_s13 = sadd.s32 1, %s4528_s13   ;;  %s5817_s21 = sld [smem:[#allocation26_spill]] }
 0xe39   : > { %p34_p2 = scmp.ge.s32.totalorder %s37_s13, 6   ;;  %s5818_s10 = sld [smem:[#allocation27_spill]] }
 0xe3a   : > { %s5819_s9 = smov %s5837_s22  ;;  %s5820_s18 = sld [smem:[#allocation34_spill]] }
 0xe3b   : > { %s5822_s23 = smov %s5819_s9  ;;  %s5823_s24 = smov %s4504_s25 }
 0xe3c   : > { %s5824_s25 = smov %s4508_s26  ;;  %s5825_s26 = smov %s4913_s28 }
 0xe3d   : > { %s5826_s27 = smov %s4520_s29  ;;  %s5827_s28 = smov %s4524_s30 }
 0xe3e   : > { %s5829_s30 = smov %s5835_s7  ;;  %36 = sbr.rel (!%p34_p2) target bundleno = 28 (0x1c), region = 174 }
 0xe3f   : > { %s5821_s22 = smov %s5818_s10 }
 0xe40   : > { %s5828_s29 = smov %s5820_s18 }
 0xe45   :  { %2871 = vsyncpa [#allocation4], 1 }
 0xe46   :  { %2873 = vsyncpa [#allocation4 + $0x1], 1 }
 0xe47   :  { %2874 = vsyncpa [#allocation7], 1 }
 0xe48   :  { %2876 = vsyncpa [#allocation7 + $0x1], 1 }
 0xe49   :  { %2877 = vsyncpa [#allocation10], 1 }
 0xe4a   :  { %2878 = vsyncpa [#allocation13], 1 }
 0xe4b   :  { %2879 = vsyncpa [#allocation5], 1 }
 0xe4c   :  { %2881 = vsyncpa [#allocation5 + $0x1], 1 }
 0xe4d   :  { %2882 = vsyncpa [#allocation17], 1 }
 0xe4e   :  { %2884 = vsyncpa [#allocation17 + $0x1], 1 }

</bundles_post_ra>
